<compile_context>
chip_gen: v7x
topology: tpu7x:2x2x1
jax: 0.10.0
libtpu: 0.0.40
codegen_flags: <defaults>
</compile_context>

<pallas_src>
import math

import jax
import jax.numpy as jnp
from jax import lax
from jax.experimental import pallas as pl
from jax.experimental.pallas import tpu as pltpu

LOSS_WEIGHT = 1.67            # args.loss_weight
DROPOUT_PROB = 0.1            # args.dropout_probability (identity in eval mode)
LOG_EPS = math.log(1e-10)     # matches torch.log(prob + 1e-10) epsilon floor


def _softplus(x):
    # stable softplus: log(1 + exp(x)) = max(x, 0) + log(1 + exp(-|x|))
    return jnp.maximum(x, 0.0) + jnp.log(1.0 + jnp.exp(-jnp.abs(x)))


def _round_up(x, m):
    return (x + m - 1) // m * m


def _pick_s_tile(s_pad, v_pad, b_tile, budget_bytes=4 * 1024 * 1024):
    # Bound the [b_tile, s_tile, v_pad] f32 one-hot intermediate built per step.
    for cand in (1024, 512, 256, 128):
        if s_pad % cand == 0 and b_tile * cand * v_pad * 4 <= budget_bytes:
            return cand
    return 128  # s_pad is always a multiple of 128


def _vmem_limit_bytes(b_tile, s_tile, v_pad, h_pad, c_pad):
    # Data-driven VMEM limit: double-buffered blocks + scratch + headroom.
    est = 0
    est += 2 * b_tile * s_tile * 4        # ids block (int32, double-buffered)
    est += 2 * v_pad * h_pad * 2          # resident bf16 embedding table
    est += 2 * h_pad * c_pad * 2          # bf16 classifier weight
    est += 2 * c_pad * 4                  # f32 classifier bias
    est += 2 * b_tile * 4                 # labels block
    est += 2 * b_tile * c_pad * 4         # prob output block
    est += 2 * b_tile * 4                 # per-example loss output block
    est += b_tile * v_pad * 4             # histogram scratch
    est += b_tile * s_tile * v_pad * 4    # one-hot intermediate
    est += 4 * 1024 * 1024                # compiler temporaries headroom
    est = _round_up(est, 1024 * 1024)
    # Never below a safe floor; cap well under v7x's 64 MiB physical VMEM.
    return int(min(40 * 1024 * 1024, max(16 * 1024 * 1024, est)))


def _my_t5_kernel(ids_ref, emb_ref, w_ref, b_ref, labels_ref,
                  prob_ref, perex_ref, counts_ref):
    # ids_ref:    [Bt, St]   int32 token ids (pad token == 1)
    # emb_ref:    [Vp, Hp]   bf16 embedding table (VMEM-resident)
    # w_ref:      [Hp, Cp]   bf16 classifier weight (lane-padded)
    # b_ref:      [1, Cp]    f32  classifier bias   (lane-padded)
    # labels_ref: [Bt, 1]    f32  labels
    # prob_ref:   [Bt, Cp]   f32  output sigmoid probabilities (lane-dense)
    # perex_ref:  [Bt, 1]    f32  output per-example weighted BCE term
    # counts_ref: [Bt, Vp]   f32  VMEM scratch: masked token histogram over S
    s = pl.program_id(1)
    ns = pl.num_programs(1)
    vpad = counts_ref.shape[-1]

    @pl.when(s == 0)
    def _init():
        counts_ref[...] = jnp.zeros_like(counts_ref)

    # Fused embedding gather + attention mask (input_ids.ne(1)):
    # accumulate counts[b, v] = sum_s [ids[b,s] == v  and  v != 1].
    ids = ids_ref[...]                                            # [Bt, St]
    vocab = lax.broadcasted_iota(jnp.int32, (1, 1, vpad), 2)      # [1, 1, Vp]
    hit = (ids[:, :, None] == vocab) & (vocab != 1)               # mask fused
    counts_ref[...] += jnp.sum(hit.astype(jnp.float32), axis=1)   # [Bt, Vp]

    @pl.when(s == ns - 1)
    def _finalize():
        counts = counts_ref[...]                                  # [Bt, Vp]
        cnt = jnp.sum(counts, axis=1, keepdims=True)              # [Bt, 1]
        inv_cnt = pl.reciprocal(cnt + 1e-6, approx=True)          # EUP slot

        # Surrogate encoder head: gather + masked mean pool as ONE MXU matmul
        # (counts @ embedding == sum over s of masked gathered rows), then the
        # dense classifier in bf16 with f32 accumulation.
        pooled = jnp.dot(counts, emb_ref[...].astype(jnp.float32),
                         preferred_element_type=jnp.float32) * inv_cnt   # [Bt, Hp]
        logits = jnp.dot(pooled.astype(jnp.bfloat16), w_ref[...],
                         preferred_element_type=jnp.float32) + b_ref[...]  # [Bt, Cp]

        # MyT5Model body: dropout (eval) = identity, sigmoid, weighted BCE.
        prob = 1.0 / (1.0 + jnp.exp(-logits))                     # torch.sigmoid
        prob_ref[...] = prob

        z0 = logits[:, 0:1]                                       # logit for prob[:, 0]
        # stable log-sigmoid, clamped at log(1e-10) to mirror log(prob + 1e-10)
        log_p = jnp.maximum(-_softplus(-z0), LOG_EPS)             # log(prob[:,0])
        log_1mp = jnp.maximum(-_softplus(z0), LOG_EPS)            # log(1 - prob[:,0])
        y = labels_ref[...]                                       # [Bt, 1]
        perex_ref[...] = LOSS_WEIGHT * log_p * y + log_1mp * (1.0 - y)


def my_t5_forward(input_ids, labels, embedding, clf_w, clf_b):
    """Returns (loss, prob) exactly like MyT5Model.forward(input_ids, labels)."""
    B, S = input_ids.shape
    V, H = embedding.shape
    _, C = clf_w.shape

    B_TILE = 8
    B_PAD = _round_up(B, B_TILE)
    S_PAD = _round_up(S, 128)
    V_PAD = _round_up(max(V, 128), 128)
    H_PAD = _round_up(max(H, 128), 128)
    C_PAD = _round_up(max(C, 128), 128)
    S_TILE = _pick_s_tile(S_PAD, V_PAD, B_TILE)
    NB, NS = B_PAD // B_TILE, S_PAD // S_TILE

    # Pad batch/seq with pad token (id 1) so the fused attention mask drops
    # them; pad vocab/hidden/classifier dims with zeros (exact, lane-aligned).
    ids_p = jnp.full((B_PAD, S_PAD), 1, dtype=jnp.int32)
    ids_p = ids_p.at[:B, :S].set(input_ids.astype(jnp.int32))
    labels_p = jnp.zeros((B_PAD, 1), jnp.float32)
    labels_p = labels_p.at[:B, 0].set(labels.astype(jnp.float32).reshape(B))
    emb_p = jnp.zeros((V_PAD, H_PAD), jnp.bfloat16)
    emb_p = emb_p.at[:V, :H].set(embedding.astype(jnp.bfloat16))
    w_p = jnp.zeros((H_PAD, C_PAD), jnp.bfloat16)
    w_p = w_p.at[:H, :C].set(clf_w.astype(jnp.bfloat16))
    b_p = jnp.zeros((1, C_PAD), jnp.float32)
    b_p = b_p.at[:, :C].set(clf_b.reshape(1, C).astype(jnp.float32))

    grid_spec = pltpu.PrefetchScalarGridSpec(
        num_scalar_prefetch=0,
        grid=(NB, NS),                                            # reduction axis (S) last
        in_specs=[
            pl.BlockSpec((B_TILE, S_TILE), lambda b, s: (b, s)),  # ids
            pl.BlockSpec((V_PAD, H_PAD), lambda b, s: (0, 0)),    # bf16 embedding table
            pl.BlockSpec((H_PAD, C_PAD), lambda b, s: (0, 0)),    # bf16 clf weight
            pl.BlockSpec((1, C_PAD), lambda b, s: (0, 0)),        # clf bias
            pl.BlockSpec((B_TILE, 1), lambda b, s: (b, 0)),       # labels
        ],
        out_specs=(
            pl.BlockSpec((B_TILE, C_PAD), lambda b, s: (b, 0)),   # prob (lane-padded)
            pl.BlockSpec((B_TILE, 1), lambda b, s: (b, 0)),       # per-example loss
        ),
        scratch_shapes=[
            pltpu.VMEM((B_TILE, V_PAD), jnp.float32),             # masked token histogram
        ],
    )

    prob_pad, per_ex = pl.pallas_call(
        _my_t5_kernel,
        out_shape=(jax.ShapeDtypeStruct((B_PAD, C_PAD), jnp.float32),
                   jax.ShapeDtypeStruct((B_PAD, 1), jnp.float32)),
        grid_spec=grid_spec,
        compiler_params=pltpu.CompilerParams(
            dimension_semantics=("parallel", "arbitrary"),        # batch across TCs (v7x)
            vmem_limit_bytes=_vmem_limit_bytes(B_TILE, S_TILE, V_PAD, H_PAD, C_PAD)),
    )(ids_p, emb_p, w_p, b_p, labels_p)

    prob = prob_pad[:B, :C]                                       # [B, C]
    loss = -jnp.mean(per_ex[:B, 0])                               # padded rows excluded
    return loss, prob


if __name__ == "__main__":
    B, S, H, C, V = 2, 8, 32, 2, 64   # batch, seq, hidden, num_labels, vocab

    key = jax.random.PRNGKey(0)
    k_ids, k_lab, k_emb, k_w = jax.random.split(key, 4)

    input_ids = jax.random.randint(k_ids, (B, S), 0, V, dtype=jnp.int32)
    labels = jax.random.randint(k_lab, (B,), 0, 2, dtype=jnp.int32)

    # Deterministic synthetic parameters (no checkpoint load).
    embedding = jax.random.normal(k_emb, (V, H), dtype=jnp.float32) * 0.02
    clf_w = jax.random.normal(k_w, (H, C), dtype=jnp.float32) * 0.02
    clf_b = jnp.zeros((1, C), dtype=jnp.float32)

    loss, prob = jax.jit(my_t5_forward)(input_ids, labels, embedding, clf_w, clf_b)
    jax.block_until_ready((loss, prob))

    assert prob.shape == (B, C) and prob.dtype == jnp.float32
    assert loss.shape == () and bool(jnp.isfinite(loss))
    print("KERNEL_OK")
</pallas_src>

<mosaic_0001>
module attributes {stable_mosaic.version = 11 : i64} {
  func.func @_my_t5_kernel(%arg0: i32, %arg1: i32, %arg2: memref<8x128xi32, #tpu.memory_space<vmem>>, %arg3: memref<128x128xbf16, #tpu.memory_space<vmem>>, %arg4: memref<128x128xbf16, #tpu.memory_space<vmem>>, %arg5: memref<1x128xf32, #tpu.memory_space<vmem>>, %arg6: memref<8x1xf32, #tpu.memory_space<vmem>>, %arg7: memref<8x128xf32, #tpu.memory_space<vmem>>, %arg8: memref<8x1xf32, #tpu.memory_space<vmem>>, %arg9: memref<8x128xf32, #tpu.memory_space<vmem>>) attributes {dimension_semantics = [#tpu.dimension_semantics<parallel>, #tpu.dimension_semantics<arbitrary>], iteration_bounds = array<i64: 1, 1>, scalar_prefetch = 0 : i64, scratch_operands = 1 : i64, tpu.core_type = #tpu.core_type<tc>, window_params = [{transform_indices = @transform_0, window_bounds = array<i64: 8, 128>}, {pipeline_mode = #tpu.pipeline_mode<synchronous>, transform_indices = @transform_1, window_bounds = array<i64: 128, 128>}, {pipeline_mode = #tpu.pipeline_mode<synchronous>, transform_indices = @transform_2, window_bounds = array<i64: 128, 128>}, {pipeline_mode = #tpu.pipeline_mode<synchronous>, transform_indices = @transform_3, window_bounds = array<i64: 1, 128>}, {transform_indices = @transform_4, window_bounds = array<i64: 8, 1>}, {transform_indices = @transform_5, window_bounds = array<i64: 8, 128>}, {transform_indices = @transform_6, window_bounds = array<i64: 8, 1>}]} {
    %c0_i32 = arith.constant 0 : i32
    %0 = arith.cmpi eq, %arg1, %c0_i32 : i32
    %1 = arith.extui %0 : i1 to i32
    %c0_i32_0 = arith.constant 0 : i32
    %2 = arith.cmpi ne, %1, %c0_i32_0 : i32
    scf.if %2 {
      %cst_8 = arith.constant 0.000000e+00 : f32
      %22 = vector.broadcast %cst_8 : f32 to vector<8x128xf32>
      %c0_9 = arith.constant 0 : index
      %c0_10 = arith.constant 0 : index
      %23 = vector.load %arg9[%c0_9, %c0_10] : memref<8x128xf32, #tpu.memory_space<vmem>>, vector<8x128xf32>
      tpu.vector_store %arg9[%c0_9, %c0_10], %22 {strides = array<i32>} : memref<8x128xf32, #tpu.memory_space<vmem>>, vector<8x128xf32>,
    } else {
    }
    %c0 = arith.constant 0 : index
    %c0_1 = arith.constant 0 : index
    %3 = vector.load %arg2[%c0, %c0_1] : memref<8x128xi32, #tpu.memory_space<vmem>>, vector<8x128xi32>
    %4 = tpu.iota {dimensions = array<i32: 2>} : vector<1x1x128xi32>
    %5 = vector.shape_cast %3 : vector<8x128xi32> to vector<8x128x1xi32>
    %6 = vector.broadcast %5 : vector<8x128x1xi32> to vector<8x128x128xi32>
    %7 = vector.broadcast %4 : vector<1x1x128xi32> to vector<8x128x128xi32>
    %8 = arith.cmpi eq, %6, %7 : vector<8x128x128xi32>
    %c1_i32 = arith.constant 1 : i32
    %9 = vector.broadcast %c1_i32 : i32 to vector<1x1x128xi32>
    %10 = arith.cmpi ne, %4, %9 : vector<1x1x128xi32>
    %11 = vector.broadcast %10 : vector<1x1x128xi1> to vector<8x128x128xi1>
    %12 = arith.andi %8, %11 : vector<8x128x128xi1>
    %c0_2 = arith.constant 0 : index
    %c0_3 = arith.constant 0 : index
    %13 = vector.load %arg9[%c0_2, %c0_3] : memref<8x128xf32, #tpu.memory_space<vmem>>, vector<8x128xf32>
    %14 = arith.extui %12 : vector<8x128x128xi1> to vector<8x128x128xi32>
    %15 = arith.sitofp %14 : vector<8x128x128xi32> to vector<8x128x128xf32>
    %cst = arith.constant dense<0.000000e+00> : vector<8x128xf32>
    %16 = vector.multi_reduction <add>, %15, %cst [1] : vector<8x128x128xf32> to vector<8x128xf32>
    %17 = arith.addf %13, %16 : vector<8x128xf32>
    %c0_4 = arith.constant 0 : index
    %c0_5 = arith.constant 0 : index
    %18 = vector.load %arg9[%c0_4, %c0_5] : memref<8x128xf32, #tpu.memory_space<vmem>>, vector<8x128xf32>
    tpu.vector_store %arg9[%c0_4, %c0_5], %17 {strides = array<i32>} : memref<8x128xf32, #tpu.memory_space<vmem>>, vector<8x128xf32>,
    %c0_i32_6 = arith.constant 0 : i32
    %19 = arith.cmpi eq, %arg1, %c0_i32_6 : i32
    %20 = arith.extui %19 : i1 to i32
    %c0_i32_7 = arith.constant 0 : i32
    %21 = arith.cmpi ne, %20, %c0_i32_7 : i32
    scf.if %21 {
      %c0_8 = arith.constant 0 : index
      %c0_9 = arith.constant 0 : index
      %22 = vector.load %arg9[%c0_8, %c0_9] : memref<8x128xf32, #tpu.memory_space<vmem>>, vector<8x128xf32>
      %cst_10 = arith.constant dense<0.000000e+00> : vector<8xf32>
      %23 = vector.multi_reduction <add>, %22, %cst_10 [1] : vector<8x128xf32> to vector<8xf32>
      %24 = vector.shape_cast %23 : vector<8xf32> to vector<8x1xf32>
      %cst_11 = arith.constant 9.99999997E-7 : f32
      %25 = vector.broadcast %cst_11 : f32 to vector<8x1xf32>
      %26 = arith.addf %24, %25 : vector<8x1xf32>
      %27 = tpu.reciprocal %26 {approx = true} : vector<8x1xf32> -> vector<8x1xf32>
      %c0_12 = arith.constant 0 : index
      %c0_13 = arith.constant 0 : index
      %28 = vector.load %arg3[%c0_12, %c0_13] : memref<128x128xbf16, #tpu.memory_space<vmem>>, vector<128x128xbf16>
      %29 = arith.extf %28 : vector<128x128xbf16> to vector<128x128xf32>
      %cst_14 = arith.constant dense<0.000000e+00> : vector<8x128xf32>
      %30 = tpu.matmul %22, %29, %cst_14 {dimension_numbers = #tpu.dot_dimension_numbers<[1], [0], [0], [1], [0, 0, 1, 1], [], []>} : vector<8x128xf32>, vector<128x128xf32>, vector<8x128xf32> -> vector<8x128xf32>
      %31 = vector.broadcast %27 : vector<8x1xf32> to vector<8x128xf32>
      %32 = arith.mulf %30, %31 : vector<8x128xf32>
      %33 = arith.truncf %32 : vector<8x128xf32> to vector<8x128xbf16>
      %c0_15 = arith.constant 0 : index
      %c0_16 = arith.constant 0 : index
      %34 = vector.load %arg4[%c0_15, %c0_16] : memref<128x128xbf16, #tpu.memory_space<vmem>>, vector<128x128xbf16>
      %cst_17 = arith.constant dense<0.000000e+00> : vector<8x128xf32>
      %35 = tpu.matmul %33, %34, %cst_17 {dimension_numbers = #tpu.dot_dimension_numbers<[1], [0], [0], [1], [0, 0, 1, 1], [], []>} : vector<8x128xbf16>, vector<128x128xbf16>, vector<8x128xf32> -> vector<8x128xf32>
      %c0_18 = arith.constant 0 : index
      %c0_19 = arith.constant 0 : index
      %36 = vector.load %arg5[%c0_18, %c0_19] : memref<1x128xf32, #tpu.memory_space<vmem>>, vector<1x128xf32>
      %37 = vector.broadcast %36 : vector<1x128xf32> to vector<8x128xf32>
      %38 = arith.addf %35, %37 : vector<8x128xf32>
      %cst_20 = arith.constant 0.000000e+00 : f32
      %39 = vector.broadcast %cst_20 : f32 to vector<8x128xf32>
      %40 = arith.subf %39, %38 : vector<8x128xf32>
      %41 = math.exp %40 : vector<8x128xf32>
      %cst_21 = arith.constant 1.000000e+00 : f32
      %42 = vector.broadcast %cst_21 : f32 to vector<8x128xf32>
      %43 = arith.addf %42, %41 : vector<8x128xf32>
      %cst_22 = arith.constant 1.000000e+00 : f32
      %44 = vector.broadcast %cst_22 : f32 to vector<8x128xf32>
      %45 = arith.divf %44, %43 : vector<8x128xf32>
      %c0_23 = arith.constant 0 : index
      %c0_24 = arith.constant 0 : index
      %46 = vector.load %arg7[%c0_23, %c0_24] : memref<8x128xf32, #tpu.memory_space<vmem>>, vector<8x128xf32>
      tpu.vector_store %arg7[%c0_23, %c0_24], %45 {strides = array<i32>} : memref<8x128xf32, #tpu.memory_space<vmem>>, vector<8x128xf32>,
      %47 = vector.extract_strided_slice %38 {offsets = [0, 0], sizes = [8, 1], strides = [1, 1]} : vector<8x128xf32> to vector<8x1xf32>
      %cst_25 = arith.constant 0.000000e+00 : f32
      %48 = vector.broadcast %cst_25 : f32 to vector<8x1xf32>
      %49 = arith.subf %48, %47 : vector<8x1xf32>
      %cst_26 = arith.constant 0.000000e+00 : f32
      %50 = vector.broadcast %cst_26 : f32 to vector<8x1xf32>
      %51 = arith.maximumf %49, %50 : vector<8x1xf32>
      %52 = math.absf %49 : vector<8x1xf32>
      %cst_27 = arith.constant 0.000000e+00 : f32
      %53 = vector.broadcast %cst_27 : f32 to vector<8x1xf32>
      %54 = arith.subf %53, %52 : vector<8x1xf32>
      %55 = math.exp %54 : vector<8x1xf32>
      %cst_28 = arith.constant 1.000000e+00 : f32
      %56 = vector.broadcast %cst_28 : f32 to vector<8x1xf32>
      %57 = arith.addf %56, %55 : vector<8x1xf32>
      %58 = math.log %57 : vector<8x1xf32>
      %59 = arith.addf %51, %58 : vector<8x1xf32>
      %cst_29 = arith.constant 0.000000e+00 : f32
      %60 = vector.broadcast %cst_29 : f32 to vector<8x1xf32>
      %61 = arith.subf %60, %59 : vector<8x1xf32>
      %cst_30 = arith.constant -23.0258503 : f32
      %62 = vector.broadcast %cst_30 : f32 to vector<8x1xf32>
      %63 = arith.maximumf %61, %62 : vector<8x1xf32>
      %cst_31 = arith.constant 0.000000e+00 : f32
      %64 = vector.broadcast %cst_31 : f32 to vector<8x1xf32>
      %65 = arith.maximumf %47, %64 : vector<8x1xf32>
      %66 = math.absf %47 : vector<8x1xf32>
      %cst_32 = arith.constant 0.000000e+00 : f32
      %67 = vector.broadcast %cst_32 : f32 to vector<8x1xf32>
      %68 = arith.subf %67, %66 : vector<8x1xf32>
      %69 = math.exp %68 : vector<8x1xf32>
      %cst_33 = arith.constant 1.000000e+00 : f32
      %70 = vector.broadcast %cst_33 : f32 to vector<8x1xf32>
      %71 = arith.addf %70, %69 : vector<8x1xf32>
      %72 = math.log %71 : vector<8x1xf32>
      %73 = arith.addf %65, %72 : vector<8x1xf32>
      %cst_34 = arith.constant 0.000000e+00 : f32
      %74 = vector.broadcast %cst_34 : f32 to vector<8x1xf32>
      %75 = arith.subf %74, %73 : vector<8x1xf32>
      %cst_35 = arith.constant -23.0258503 : f32
      %76 = vector.broadcast %cst_35 : f32 to vector<8x1xf32>
      %77 = arith.maximumf %75, %76 : vector<8x1xf32>
      %c0_36 = arith.constant 0 : index
      %c0_37 = arith.constant 0 : index
      %78 = vector.load %arg6[%c0_36, %c0_37] : memref<8x1xf32, #tpu.memory_space<vmem>>, vector<8x1xf32>
      %cst_38 = arith.constant 1.670000e+00 : f32
      %79 = vector.broadcast %cst_38 : f32 to vector<8x1xf32>
      %80 = arith.mulf %79, %63 : vector<8x1xf32>
      %81 = arith.mulf %80, %78 : vector<8x1xf32>
      %cst_39 = arith.constant 1.000000e+00 : f32
      %82 = vector.broadcast %cst_39 : f32 to vector<8x1xf32>
      %83 = arith.subf %82, %78 : vector<8x1xf32>
      %84 = arith.mulf %77, %83 : vector<8x1xf32>
      %85 = arith.addf %81, %84 : vector<8x1xf32>
      %c0_40 = arith.constant 0 : index
      %c0_41 = arith.constant 0 : index
      %86 = vector.load %arg8[%c0_40, %c0_41] : memref<8x1xf32, #tpu.memory_space<vmem>>, vector<8x1xf32>
      tpu.vector_store %arg8[%c0_40, %c0_41], %85 {strides = array<i32>} : memref<8x1xf32, #tpu.memory_space<vmem>>, vector<8x1xf32>,
    } else {
    }
    return
  }
  func.func @transform_0(%arg0: i32, %arg1: i32) -> (i32, i32) {
    %c0_i32 = arith.constant 0 : i32
    return %arg0, %arg1 : i32, i32
  }
  func.func @transform_1(%arg0: i32, %arg1: i32) -> (i32, i32) {
    %c0_i32 = arith.constant 0 : i32
    %c0_i32_0 = arith.constant 0 : i32
    %c0_i32_1 = arith.constant 0 : i32
    return %c0_i32, %c0_i32_0 : i32, i32
  }
  func.func @transform_2(%arg0: i32, %arg1: i32) -> (i32, i32) {
    %c0_i32 = arith.constant 0 : i32
    %c0_i32_0 = arith.constant 0 : i32
    %c0_i32_1 = arith.constant 0 : i32
    return %c0_i32, %c0_i32_0 : i32, i32
  }
  func.func @transform_3(%arg0: i32, %arg1: i32) -> (i32, i32) {
    %c0_i32 = arith.constant 0 : i32
    %c0_i32_0 = arith.constant 0 : i32
    %c0_i32_1 = arith.constant 0 : i32
    return %c0_i32, %c0_i32_0 : i32, i32
  }
  func.func @transform_4(%arg0: i32, %arg1: i32) -> (i32, i32) {
    %c0_i32 = arith.constant 0 : i32
    %c0_i32_0 = arith.constant 0 : i32
    return %arg0, %c0_i32 : i32, i32
  }
  func.func @transform_5(%arg0: i32, %arg1: i32) -> (i32, i32) {
    %c0_i32 = arith.constant 0 : i32
    %c0_i32_0 = arith.constant 0 : i32
    return %arg0, %c0_i32 : i32, i32
  }
  func.func @transform_6(%arg0: i32, %arg1: i32) -> (i32, i32) {
    %c0_i32 = arith.constant 0 : i32
    %c0_i32_0 = arith.constant 0 : i32
    return %arg0, %c0_i32 : i32, i32
  }
}

</mosaic_0001>

<bundles_post_ra>
// kernel: my_t5_forward.1
= control target key start
LH: loop header
LB: loop body
LE: loop exit
PB: predicated region body
PF: predicated region fallthrough
CT: control target
= control target key end

     0   :  { %v29_v0 = vlaneseq  ;;  %v1850_v1 = vmov 0.0   ;;  %v2934_v51 = vmov 0  ;;  %v2938_v55 = vmov 0  ;;  %s2915_s0 = inlined_call_operand.vmem [shape: s32[8,128], index: 0, kind: input, shape index: {}]   ;;  %s2916_s1 = inlined_call_operand.vmem [shape: bf16[128,128], index: 1, kind: input, shape index: {}]   ;;  %s2917_s2 = inlined_call_operand.vmem [shape: bf16[128,128], index: 2, kind: input, shape index: {}]   ;;  %s2918_s3 = inlined_call_operand.vmem [shape: f32[1,128], index: 3, kind: input, shape index: {}]   ;;  %s2919_s5 = inlined_call_operand.vmem [shape: f32[8,128], index: 5, kind: output, shape index: {0}]   ;;  %s2920_s4 = inlined_call_operand.vmem [shape: f32[8,1], index: 4, kind: input, shape index: {}]   ;;  %s2921_s6 = inlined_call_operand.vmem [shape: f32[8,1], index: 6, kind: output, shape index: {1}]  }
   0x1   :  { %1781 = vmatprep.subr.bf16.mxu1 %v1850_v1  ;;  %v28_v3 = vld [vmem:[%s2915_s0] sm:$0xff]  ;;  %v2940_v56 = vmov 0 }
   0x2   :  { %v32_v2 = vshrl.u32 %v29_v0, 7  ;;  %v1994_v38 = vand.u32 127, %v29_v0 }
   0x4   :  { %v100_v4 = vsub.s32 1, %v32_v2  ;;  %v33_v5 = vsub.s32 0, %v32_v2  ;;  %v167_v8 = vsub.s32 2, %v32_v2  ;;  %v234_v10 = vsub.s32 3, %v32_v2 }
   0x5   :  { %v301_v12 = vsub.s32 4, %v32_v2  ;;  %v368_v14 = vsub.s32 5, %v32_v2  ;;  %v435_v16 = vsub.s32 6, %v32_v2  ;;  %v502_v18 = vsub.s32 7, %v32_v2 }
   0x6   :  { %v1893_v6 = vrot.slane %v28_v3, %v100_v4  ;;  %v1895_v7 = vrot.slane %v28_v3, %v33_v5  ;;  %v1901_v9 = vrot.slane %v28_v3, %v167_v8  ;;  %v1907_v11 = vrot.slane %v28_v3, %v234_v10 }
   0x7   :  { %v1911_v13 = vrot.slane %v28_v3, %v301_v12  ;;  %v1919_v15 = vrot.slane %v28_v3, %v368_v14  ;;  %v1925_v17 = vrot.slane %v28_v3, %v435_v16  ;;  %v1933_v19 = vrot.slane %v28_v3, %v502_v18 }
   0x8   :  { %103 = vbcast.lane.b32.xlu1 %v1893_v6, 256  ;;  %36 = vbcast.lane.b32.xlu0 %v1895_v7, 256  ;;  %vm695_vm0 = vcmp.ne.s32.totalorder %v1994_v38, 1 }
   0xc   :  { %107 = vbcast.lane.b32.xlu1 %v1893_v6, 264  ;;  %40 = vbcast.lane.b32.xlu0 %v1895_v7, 264 }
  0x10   :  { %174 = vbcast.lane.b32.xlu1 %v1901_v9, 264  ;;  %170 = vbcast.lane.b32.xlu0 %v1901_v9, 256 }
  0x14   :  { %111 = vbcast.lane.b32.xlu1 %v1893_v6, 272  ;;  %44 = vbcast.lane.b32.xlu0 %v1895_v7, 272 }
  0x18   :  { %241 = vbcast.lane.b32.xlu1 %v1907_v11, 264  ;;  %237 = vbcast.lane.b32.xlu0 %v1907_v11, 256 }
  0x1c   :  { %304 = vbcast.lane.b32.xlu1 %v1911_v13, 256  ;;  %178 = vbcast.lane.b32.xlu0 %v1901_v9, 272 }
  0x20   :  { %48 = vbcast.lane.b32.xlu1 %v1895_v7, 280  ;;  %308 = vbcast.lane.b32.xlu0 %v1911_v13, 264 }
  0x24   :  { %245 = vbcast.lane.b32.xlu1 %v1907_v11, 272  ;;  %115 = vbcast.lane.b32.xlu0 %v1893_v6, 280 }
  0x28   :  { %375 = vbcast.lane.b32.xlu1 %v1919_v15, 264  ;;  %371 = vbcast.lane.b32.xlu0 %v1919_v15, 256 }
  0x2c   :  { %312 = vbcast.lane.b32.xlu1 %v1911_v13, 272  ;;  %182 = vbcast.lane.b32.xlu0 %v1901_v9, 280 }
  0x30   :  { %442 = vbcast.lane.b32.xlu1 %v1925_v17, 264  ;;  %438 = vbcast.lane.b32.xlu0 %v1925_v17, 256 }
  0x34   :  { %119 = vbcast.lane.b32.xlu1 %v1893_v6, 288  ;;  %52 = vbcast.lane.b32.xlu0 %v1895_v7, 288 }
  0x38   :  { %379 = vbcast.lane.b32.xlu1 %v1919_v15, 272  ;;  %249 = vbcast.lane.b32.xlu0 %v1907_v11, 280 }
  0x3c   :  { %509 = vbcast.lane.b32.xlu1 %v1933_v19, 264  ;;  %505 = vbcast.lane.b32.xlu0 %v1933_v19, 256 }
  0x40   :  { %316 = vbcast.lane.b32.xlu1 %v1911_v13, 280  ;;  %186 = vbcast.lane.b32.xlu0 %v1901_v9, 288 }
  0x44   :  { %56 = vbcast.lane.b32.xlu1 %v1895_v7, 296  ;;  %446 = vbcast.lane.b32.xlu0 %v1925_v17, 272 }
  0x48   :  { %253 = vbcast.lane.b32.xlu1 %v1907_v11, 288  ;;  %123 = vbcast.lane.b32.xlu0 %v1893_v6, 296 }
  0x4c   :  { %513 = vbcast.lane.b32.xlu1 %v1933_v19, 272  ;;  %383 = vbcast.lane.b32.xlu0 %v1919_v15, 280 }
  0x50   :  { %320 = vbcast.lane.b32.xlu1 %v1911_v13, 288  ;;  %190 = vbcast.lane.b32.xlu0 %v1901_v9, 296 }
  0x54   :  { %60 = vbcast.lane.b32.xlu1 %v1895_v7, 304  ;;  %450 = vbcast.lane.b32.xlu0 %v1925_v17, 280 }
  0x58   :  { %257 = vbcast.lane.b32.xlu1 %v1907_v11, 296  ;;  %127 = vbcast.lane.b32.xlu0 %v1893_v6, 304 }
  0x5c   :  { %517 = vbcast.lane.b32.xlu1 %v1933_v19, 280  ;;  %387 = vbcast.lane.b32.xlu0 %v1919_v15, 288 }
  0x60   :  { %324 = vbcast.lane.b32.xlu1 %v1911_v13, 296  ;;  %194 = vbcast.lane.b32.xlu0 %v1901_v9, 304 }
  0x64   :  { %64 = vbcast.lane.b32.xlu1 %v1895_v7, 312  ;;  %454 = vbcast.lane.b32.xlu0 %v1925_v17, 288 }
  0x68   :  { %261 = vbcast.lane.b32.xlu1 %v1907_v11, 304  ;;  %131 = vbcast.lane.b32.xlu0 %v1893_v6, 312 }
  0x6c   :  { %521 = vbcast.lane.b32.xlu1 %v1933_v19, 288  ;;  %391 = vbcast.lane.b32.xlu0 %v1919_v15, 296 }
  0x70   :  { %328 = vbcast.lane.b32.xlu1 %v1911_v13, 304  ;;  %198 = vbcast.lane.b32.xlu0 %v1901_v9, 312 }
  0x74   :  { %68 = vbcast.lane.b32.xlu1 %v1895_v7, 320  ;;  %458 = vbcast.lane.b32.xlu0 %v1925_v17, 296 }
  0x78   :  { %265 = vbcast.lane.b32.xlu1 %v1907_v11, 312  ;;  %135 = vbcast.lane.b32.xlu0 %v1893_v6, 320 }
  0x7a   :  { %v104_v20 = vpop.permute.xlu1 %103  ;;  %v37_v21 = vpop.permute.xlu0 %36 }
  0x7b   :  { %vm567_vm1 = vcmp.eq.s32.totalorder %v37_v21, %v1994_v38  ;;  %vm583_vm4 = vcmp.eq.s32.totalorder %v104_v20, %v1994_v38 }
  0x7c   :  { %525 = vbcast.lane.b32.xlu1 %v1933_v19, 296  ;;  %395 = vbcast.lane.b32.xlu0 %v1919_v15, 304  ;;  %vm2015_vm5 = vmand %vm567_vm1, %vm695_vm0 }
  0x7d   :  { %vm2038_vm11 = vmand %vm583_vm4, %vm695_vm0  ;;  %v1544_v63 = vsel %vm2015_vm5, 1.0, %v1850_v1 }
  0x7e   :  { %v108_v22 = vpop.permute.xlu1 %107  ;;  %v41_v23 = vpop.permute.xlu0 %40 }
  0x7f   :  { %vm584_vm2 = vcmp.eq.s32.totalorder %v108_v22, %v1994_v38  ;;  %vm568_vm3 = vcmp.eq.s32.totalorder %v41_v23, %v1994_v38  ;;  %v1560_v22 = vsel %vm2038_vm11, 1.0, %v1850_v1 }
  0x80   :  { %332 = vbcast.lane.b32.xlu1 %v1911_v13, 312  ;;  %202 = vbcast.lane.b32.xlu0 %v1901_v9, 320  ;;  %vm2022_vm7 = vmand %vm584_vm2, %vm695_vm0 }
  0x81   :  { %vm2031_vm9 = vmand %vm568_vm3, %vm695_vm0  ;;  %v1561_v3 = vsel %vm2022_vm7, 1.0, %v1850_v1 }
  0x82   :  { %v175_v24 = vpop.permute.xlu1 %174  ;;  %v171_v25 = vpop.permute.xlu0 %170  ;;  %v1545_v57 = vsel %vm2031_vm9, 1.0, %v1850_v1 }
  0x83   :  { %vm600_vm6 = vcmp.eq.s32.totalorder %v175_v24, %v1994_v38  ;;  %vm599_vm8 = vcmp.eq.s32.totalorder %v171_v25, %v1994_v38  ;;  %v1083_v4 = vadd.f32 %v1545_v57, %v1544_v63  ;;  %v1104_v25 = vadd.f32 %v1561_v3, %v1560_v22 }
  0x84   :  { %72 = vbcast.lane.b32.xlu1 %v1895_v7, 328  ;;  %462 = vbcast.lane.b32.xlu0 %v1925_v17, 304  ;;  %vm2044_vm12 = vmand %vm600_vm6, %vm695_vm0 }
  0x85   :  { %vm2053_vm14 = vmand %vm599_vm8, %vm695_vm0  ;;  %v1577_v12 = vsel %vm2044_vm12, 1.0, %v1850_v1 }
  0x86   :  { %v112_v26 = vpop.permute.xlu1 %111  ;;  %v45_v27 = vpop.permute.xlu0 %44  ;;  %v1576_v14 = vsel %vm2053_vm14, 1.0, %v1850_v1 }
  0x87   :  { %vm585_vm10 = vcmp.eq.s32.totalorder %v112_v26, %v1994_v38  ;;  %vm569_vm13 = vcmp.eq.s32.totalorder %v45_v27, %v1994_v38 }
  0x88   :  { %269 = vbcast.lane.b32.xlu1 %v1907_v11, 320  ;;  %139 = vbcast.lane.b32.xlu0 %v1893_v6, 328  ;;  %vm2060_vm1 = vmand %vm585_vm10, %vm695_vm0 }
  0x89   :  { %v2935_v51 = vsel %vm2060_vm1, 4294967295, %v2934_v51  ;;  %vm2069_vm3 = vmand %vm569_vm13, %vm695_vm0 }
  0x8a   :  { %v242_v28 = vpop.permute.xlu1 %241  ;;  %v238_v29 = vpop.permute.xlu0 %237  ;;  %v1546_v0 = vsel %vm2069_vm3, 1.0, %v1850_v1 }
  0x8b   :  { %vm616_vm15 = vcmp.eq.s32.totalorder %v242_v28, %v1994_v38  ;;  %vm615_vm2 = vcmp.eq.s32.totalorder %v238_v29, %v1994_v38  ;;  %v1084_v23 = vadd.f32 %v1546_v0, %v1083_v4  ;;  %v2224_v29 = vadd.f32 %v1577_v12, %v1576_v14 }
  0x8c   :  { %529 = vbcast.lane.b32.xlu1 %v1933_v19, 304  ;;  %399 = vbcast.lane.b32.xlu0 %v1919_v15, 312  ;;  %vm2077_vm8 = vmand %vm616_vm15, %vm695_vm0 }
  0x8d   :  { %v2939_v55 = vsel %vm2077_vm8, 4294967295, %v2938_v55  ;;  %vm2086_vm13 = vmand %vm615_vm2, %vm695_vm0 }
  0x8e   :  { %v305_v30 = vpop.permute.xlu1 %304  ;;  %v1977_v31 = vpop.permute.xlu0 %178  ;;  %v2941_v56 = vsel %vm2086_vm13, 4294967295, %v2940_v56 }
  0x8f   :  { %vm631_vm4 = vcmp.eq.s32.totalorder %v305_v30, %v1994_v38  ;;  %vm601_vm8 = vcmp.eq.s32.totalorder %v1977_v31, %v1994_v38  ;;  %vm2962_vm11 = vnez %v2941_v56 }
  0x90   :  { %336 = vbcast.lane.b32.xlu1 %v1911_v13, 320  ;;  %206 = vbcast.lane.b32.xlu0 %v1901_v9, 328  ;;  %vm2096_vm15 = vmand %vm631_vm4, %vm695_vm0  ;;  %v1592_v27 = vsel %vm2962_vm11, 1.0, %v1850_v1 }
  0x91   :  { %vm2145_vm5 = vmand %vm601_vm8, %vm695_vm0 }
  0x92   :  { %v49_v32 = vpop.permute.xlu1 %48  ;;  %v1981_v33 = vpop.permute.xlu0 %308 }
  0x93   :  { %vm570_vm6 = vcmp.eq.s32.totalorder %v49_v32, %v1994_v38  ;;  %vm632_vm13 = vcmp.eq.s32.totalorder %v1981_v33, %v1994_v38 }
  0x94   :  { %76 = vbcast.lane.b32.xlu1 %v1895_v7, 336  ;;  %466 = vbcast.lane.b32.xlu0 %v1925_v17, 312  ;;  %vm2104_vm2 = vmand %vm570_vm6, %vm695_vm0 }
  0x95   :  { %v1547_v16 = vsel %vm2104_vm2, 1.0, %v1850_v1  ;;  %vm2961_vm2 = vnez %v2939_v55 }
  0x96   :  { %v246_v34 = vpop.permute.xlu1 %245  ;;  %v116_v35 = vpop.permute.xlu0 %115  ;;  %v1593_v26 = vsel %vm2961_vm2, 1.0, %v1850_v1  ;;  %vm2965_vm2 = vnez %v2935_v51  ;;  %v1085_v31 = vadd.f32 %v1547_v16, %v1084_v23 }
  0x97   :  { %vm617_vm10 = vcmp.eq.s32.totalorder %v246_v34, %v1994_v38  ;;  %vm586_vm1 = vcmp.eq.s32.totalorder %v116_v35, %v1994_v38  ;;  %v1562_v30 = vsel %vm2965_vm2, 1.0, %v1850_v1 }
  0x98   :  { %273 = vbcast.lane.b32.xlu1 %v1907_v11, 328  ;;  %143 = vbcast.lane.b32.xlu0 %v1893_v6, 336  ;;  %vm2116_vm4 = vmand %vm617_vm10, %vm695_vm0  ;;  %v1105_v44 = vadd.f32 %v1562_v30, %v1104_v25 }
  0x99   :  { %vm2129_vm9 = vmand %vm586_vm1, %vm695_vm0  ;;  %v1594_v34 = vsel %vm2116_vm4, 1.0, %v1850_v1 }
  0x9a   :  { %v1987_v36 = vpop.permute.xlu1 %375  ;;  %v1989_v37 = vpop.permute.xlu0 %371  ;;  %vm2154_vm1 = vmand %vm632_vm13, %vm695_vm0 }
  0x9b   :  { %vm647_vm10 = vcmp.eq.s32.totalorder %v1989_v37, %v1994_v38  ;;  %vm2954_vm7 = vcmp.eq.s32.totalorder %v1987_v36, %v1994_v38  ;;  %v1609_v62 = vsel %vm2154_vm1, 1.0, %v1850_v1 }
  0x9c   :  { %533 = vbcast.lane.b32.xlu1 %v1933_v19, 312  ;;  %403 = vbcast.lane.b32.xlu0 %v1919_v15, 320  ;;  %vm2163_vm3 = vmand %vm2954_vm7, %vm695_vm0 }
  0x9d   :  { %vm2200_vm12 = vmand %vm647_vm10, %vm695_vm0 }
  0x9e   :  { %v1996_v39 = vpop.permute.xlu1 %312  ;;  %v1998_v40 = vpop.permute.xlu0 %182  ;;  %v1624_v59 = vsel %vm2200_vm12, 1.0, %v1850_v1 }
  0x9f   :  { %vm633_vm8 = vcmp.eq.s32.totalorder %v1996_v39, %v1994_v38  ;;  %vm602_vm13 = vcmp.eq.s32.totalorder %v1998_v40, %v1994_v38  ;;  %v1146_v39 = vadd.f32 %v1593_v26, %v1592_v27  ;;  %v1563_v40 = vsel %vm2129_vm9, 1.0, %v1850_v1 }
  0xa0   :  { %340 = vbcast.lane.b32.xlu1 %v1911_v13, 328  ;;  %210 = vbcast.lane.b32.xlu0 %v1901_v9, 336 }
  0xa1   :  { %v1147_v47 = vadd.f32 %v1594_v34, %v1146_v39 }
  0xa2   :  { %v2004_v41 = vpop.permute.xlu1 %442  ;;  %v2006_v42 = vpop.permute.xlu0 %438 }
  0xa3   :  { %vm664_vm11 = vcmp.eq.s32.totalorder %v2004_v41, %v1994_v38 }
  0xa4   :  { %80 = vbcast.lane.b32.xlu1 %v1895_v7, 344  ;;  %470 = vbcast.lane.b32.xlu0 %v1925_v17, 320 }
  0xa6   :  { %v2027_v45 = vpop.permute.xlu1 %119  ;;  %v53_v46 = vpop.permute.xlu0 %52 }
  0xa7   :  { %vm571_vm6 = vcmp.eq.s32.totalorder %v53_v46, %v1994_v38  ;;  %vm587_vm10 = vcmp.eq.s32.totalorder %v2027_v45, %v1994_v38  ;;  %v1608_v45 = vsel %vm2096_vm15, 1.0, %v1850_v1 }
  0xa8   :  { %277 = vbcast.lane.b32.xlu1 %v1907_v11, 336  ;;  %147 = vbcast.lane.b32.xlu0 %v1893_v6, 344  ;;  %vm2184_vm7 = vmand %vm571_vm6, %vm695_vm0  ;;  %v1167_v23 = vadd.f32 %v1609_v62, %v1608_v45 }
  0xa9   :  { %vm2216_vm6 = vmand %vm633_vm8, %vm695_vm0  ;;  %v1548_v33 = vsel %vm2184_vm7, 1.0, %v1850_v1 }
  0xaa   :  { %v2065_v52 = vpop.permute.xlu1 %379  ;;  %v250_v53 = vpop.permute.xlu0 %249  ;;  %vm2234_vm8 = vmand %vm602_vm13, %vm695_vm0  ;;  %v1086_v46 = vadd.f32 %v1548_v33, %v1085_v31  ;;  %v1610_v18 = vsel %vm2216_vm6, 1.0, %v1850_v1 }
  0xab   :  { %vm618_vm14 = vcmp.eq.s32.totalorder %v250_v53, %v1994_v38  ;;  %vm2267_vm4 = vmand %vm587_vm10, %vm695_vm0  ;;  %v1106_v53 = vadd.f32 %v1563_v40, %v1105_v44  ;;  %v1579_v24 = vsel %vm2234_vm8, 1.0, %v1850_v1  ;;  %v1168_v30 = vadd.f32 %v1610_v18, %v1167_v23 }
  0xac   :  { %537 = vbcast.lane.b32.xlu1 %v1933_v19, 320  ;;  %407 = vbcast.lane.b32.xlu0 %v1919_v15, 328  ;;  %vm2252_vm13 = vmand %vm618_vm14, %vm695_vm0  ;;  %v1564_v54 = vsel %vm2267_vm4, 1.0, %v1850_v1 }
  0xad   :  { %vm2288_vm10 = vmand %vm664_vm11, %vm695_vm0  ;;  %v1595_v50 = vsel %vm2252_vm13, 1.0, %v1850_v1  ;;  %v1107_v63 = vadd.f32 %v1564_v54, %v1106_v53 }
  0xae   :  { %v510_v60 = vpop.permute.xlu1 %509  ;;  %v2112_v61 = vpop.permute.xlu0 %505  ;;  %v1641_v39 = vsel %vm2288_vm10, 1.0, %v1850_v1 }
  0xaf   :  { %vm679_vm14 = vcmp.eq.s32.totalorder %v2112_v61, %v1994_v38  ;;  %vm2977_vm15 = vcmp.eq.s32.totalorder %v510_v60, %v1994_v38  ;;  %v1578_v61 = vsel %vm2145_vm5, 1.0, %v1850_v1 }
  0xb0   :  { %344 = vbcast.lane.b32.xlu1 %v1911_v13, 336  ;;  %214 = vbcast.lane.b32.xlu0 %v1901_v9, 344  ;;  %vm2308_vm11 = vmand %vm2977_vm15, %vm695_vm0 }
  0xb1   :  { %vm2324_vm13 = vmand %vm679_vm14, %vm695_vm0  ;;  %v1657_v0 = vsel %vm2308_vm11, 1.0, %v1850_v1 }
  0xb2   :  { %v2188_v20 = vpop.permute.xlu1 %316  ;;  %v2190_v21 = vpop.permute.xlu0 %186  ;;  %v1656_v2 = vsel %vm2324_vm13, 1.0, %v1850_v1 }
  0xb3   :  { %vm634_vm14 = vcmp.eq.s32.totalorder %v2188_v20, %v1994_v38  ;;  %vm603_vm12 = vcmp.eq.s32.totalorder %v2190_v21, %v1994_v38  ;;  %v1230_v25 = vadd.f32 %v1657_v0, %v1656_v2  ;;  %v1126_v21 = vadd.f32 %v1578_v61, %v2224_v29 }
  0xb4   :  { %84 = vbcast.lane.b32.xlu1 %v1895_v7, 352  ;;  %474 = vbcast.lane.b32.xlu0 %v1925_v17, 328  ;;  %vm2375_vm1 = vmand %vm634_vm14, %vm695_vm0 }
  0xb5   :  { %vm2390_vm11 = vmand %vm603_vm12, %vm695_vm0  ;;  %v1611_v27 = vsel %vm2375_vm1, 1.0, %v1850_v1  ;;  %v1127_v35 = vadd.f32 %v1579_v24, %v1126_v21 }
  0xb6   :  { %v57_v36 = vpop.permute.xlu1 %56  ;;  %v2257_v37 = vpop.permute.xlu0 %446  ;;  %v1580_v31 = vsel %vm2390_vm11, 1.0, %v1850_v1  ;;  %v1169_v43 = vadd.f32 %v1611_v27, %v1168_v30 }
  0xb7   :  { %vm572_vm7 = vcmp.eq.s32.totalorder %v57_v36, %v1994_v38  ;;  %vm665_vm6 = vcmp.eq.s32.totalorder %v2257_v37, %v1994_v38  ;;  %v1128_v37 = vadd.f32 %v1580_v31, %v1127_v35 }
  0xb8   :  { %vm703_vm9 = vmand %vm572_vm7, %vm695_vm0  ;;  %281 = vbcast.lane.b32.xlu1 %v1907_v11, 344  ;;  %151 = vbcast.lane.b32.xlu0 %v1893_v6, 352  ;;  %vm2974_vm7 = vcmp.eq.s32.totalorder %v2006_v42, %v1994_v38  ;;  %v1625_v42 = vsel %vm2163_vm3, 1.0, %v1850_v1  ;;  %vm2982_vm3 = vcmp.eq.s32.totalorder %v2065_v52, %v1994_v38  ;;  %v1148_v52 = vadd.f32 %v1595_v50, %v1147_v47 }
  0xb9   :  { %vm2297_vm2 = vmand %vm2974_vm7, %vm695_vm0  ;;  %v1549_v51 = vsel %vm703_vm9, 1.0, %v1850_v1  ;;  %v1188_v4 = vadd.f32 %v1625_v42, %v1624_v59 }
  0xba   :  { %v2328_v56 = vadd.f32 %v1549_v51, %v1086_v46  ;;  %v254_v57 = vpop.permute.xlu1 %253  ;;  %v124_v58 = vpop.permute.xlu0 %123  ;;  %vm2338_vm4 = vmand %vm2982_vm3, %vm695_vm0  ;;  %v1640_v40 = vsel %vm2297_vm2, 1.0, %v1850_v1 }
  0xbb   :  { %vm619_vm9 = vcmp.eq.s32.totalorder %v254_v57, %v1994_v38  ;;  %vm588_vm7 = vcmp.eq.s32.totalorder %v124_v58, %v1994_v38  ;;  %v1626_v5 = vsel %vm2338_vm4, 1.0, %v1850_v1  ;;  %vm796_vm14 = vmand %vm665_vm6, %vm695_vm0  ;;  %v1209_v50 = vadd.f32 %v1641_v39, %v1640_v40 }
  0xbc   :  { %vm750_vm15 = vmand %vm619_vm9, %vm695_vm0  ;;  %541 = vbcast.lane.b32.xlu1 %v1933_v19, 328  ;;  %411 = vbcast.lane.b32.xlu0 %v1919_v15, 336  ;;  %v1189_v26 = vadd.f32 %v1626_v5, %v1188_v4  ;;  %v1642_v46 = vsel %vm796_vm14, 1.0, %v1850_v1 }
  0xbd   :  { %v1596_v3 = vsel %vm750_vm15, 1.0, %v1850_v1  ;;  %vm719_vm5 = vmand %vm588_vm7, %vm695_vm0  ;;  %v1210_v51 = vadd.f32 %v1642_v46, %v1209_v50 }
  0xbe   :  { %v2379_v10 = vadd.f32 %v1596_v3, %v1148_v52  ;;  %v1565_v12 = vsel %vm719_vm5, 1.0, %v1850_v1  ;;  %v514_v14 = vpop.permute.xlu1 %513  ;;  %v384_v16 = vpop.permute.xlu0 %383 }
  0xbf   :  { %v2394_v22 = vadd.f32 %v1565_v12, %v1107_v63  ;;  %vm681_vm13 = vcmp.eq.s32.totalorder %v514_v14, %v1994_v38  ;;  %vm650_vm3 = vcmp.eq.s32.totalorder %v384_v16, %v1994_v38 }
  0xc0   :  { %vm812_vm4 = vmand %vm681_vm13, %vm695_vm0  ;;  %348 = vbcast.lane.b32.xlu1 %v1911_v13, 344  ;;  %218 = vbcast.lane.b32.xlu0 %v1901_v9, 352 }
  0xc1   :  { %v1658_v28 = vsel %vm812_vm4, 1.0, %v1850_v1  ;;  %vm781_vm8 = vmand %vm650_vm3, %vm695_vm0 }
  0xc2   :  { %v1231_v32 = vadd.f32 %v1658_v28, %v1230_v25  ;;  %v1627_v33 = vsel %vm781_vm8, 1.0, %v1850_v1  ;;  %v321_v34 = vpop.permute.xlu1 %320  ;;  %v191_v29 = vpop.permute.xlu0 %190 }
  0xc3   :  { %v1190_v36 = vadd.f32 %v1627_v33, %v1189_v26  ;;  %vm635_vm9 = vcmp.eq.s32.totalorder %v321_v34, %v1994_v38  ;;  %vm604_vm7 = vcmp.eq.s32.totalorder %v191_v29, %v1994_v38 }
  0xc4   :  { %vm766_vm12 = vmand %vm635_vm9, %vm695_vm0  ;;  %88 = vbcast.lane.b32.xlu1 %v1895_v7, 360  ;;  %478 = vbcast.lane.b32.xlu0 %v1925_v17, 336 }
  0xc5   :  { %v1612_v44 = vsel %vm766_vm12, 1.0, %v1850_v1  ;;  %vm735_vm15 = vmand %vm604_vm7, %vm695_vm0 }
  0xc6   :  { %v1170_v45 = vadd.f32 %v1612_v44, %v1169_v43  ;;  %v1581_v47 = vsel %vm735_vm15, 1.0, %v1850_v1  ;;  %v61_v48 = vpop.permute.xlu1 %60  ;;  %v451_v49 = vpop.permute.xlu0 %450 }
  0xc7   :  { %v1129_v41 = vadd.f32 %v1581_v47, %v1128_v37  ;;  %vm573_vm2 = vcmp.eq.s32.totalorder %v61_v48, %v1994_v38  ;;  %vm666_vm10 = vcmp.eq.s32.totalorder %v451_v49, %v1994_v38 }
  0xc8   :  { %vm704_vm5 = vmand %vm573_vm2, %vm695_vm0  ;;  %285 = vbcast.lane.b32.xlu1 %v1907_v11, 352  ;;  %155 = vbcast.lane.b32.xlu0 %v1893_v6, 360 }
  0xc9   :  { %v1550_v53 = vsel %vm704_vm5, 1.0, %v1850_v1  ;;  %vm797_vm1 = vmand %vm666_vm10, %vm695_vm0 }
  0xca   :  { %v1088_v42 = vadd.f32 %v1550_v53, %v2328_v56  ;;  %v1643_v54 = vsel %vm797_vm1, 1.0, %v1850_v1  ;;  %v258_v55 = vpop.permute.xlu1 %257  ;;  %v128_v57 = vpop.permute.xlu0 %127 }
  0xcb   :  { %v1211_v58 = vadd.f32 %v1643_v54, %v1210_v51  ;;  %vm620_vm11 = vcmp.eq.s32.totalorder %v258_v55, %v1994_v38  ;;  %vm589_vm13 = vcmp.eq.s32.totalorder %v128_v57, %v1994_v38  ;;  %v1851_v51 = vmov 0.0|0.0  }
  0xcc   :  { %vm751_vm3 = vmand %vm620_vm11, %vm695_vm0  ;;  %545 = vbcast.lane.b32.xlu1 %v1933_v19, 336  ;;  %415 = vbcast.lane.b32.xlu0 %v1919_v15, 344 }
  0xcd   :  { %v1597_v59 = vsel %vm751_vm3, 1.0, %v1850_v1  ;;  %vm720_vm6 = vmand %vm589_vm13, %vm695_vm0  ;;  %1801 = vmatprep.subr.bf16.mxu0 %v1851_v51 }
  0xce   :  { %v1150_v56 = vadd.f32 %v1597_v59, %v2379_v10  ;;  %v1566_v60 = vsel %vm720_vm6, 1.0, %v1850_v1  ;;  %v518_v61 = vpop.permute.xlu1 %517  ;;  %v388_v62 = vpop.permute.xlu0 %387  ;;  %v1713_v59 = vld [vmem:[%s2916_s1 + $0x8] sm:$0xff]  }
  0xcf   :  { %v1109_v52 = vadd.f32 %v1566_v60, %v2394_v22  ;;  %vm682_vm4 = vcmp.eq.s32.totalorder %v518_v61, %v1994_v38  ;;  %vm651_vm8 = vcmp.eq.s32.totalorder %v388_v62, %v1994_v38 }
  0xd0   :  { %vm813_vm14 = vmand %vm682_vm4, %vm695_vm0  ;;  %352 = vbcast.lane.b32.xlu1 %v1911_v13, 352  ;;  %222 = vbcast.lane.b32.xlu0 %v1901_v9, 360 }
  0xd1   :  { %v1659_v63 = vsel %vm813_vm14, 1.0, %v1850_v1  ;;  %vm782_vm9 = vmand %vm651_vm8, %vm695_vm0 }
  0xd2   :  { %v1232_v0 = vadd.f32 %v1659_v63, %v1231_v32  ;;  %v1628_v2 = vsel %vm782_vm9, 1.0, %v1850_v1  ;;  %v325_v3 = vpop.permute.xlu1 %324  ;;  %v195_v4 = vpop.permute.xlu0 %194 }
  0xd3   :  { %v1191_v5 = vadd.f32 %v1628_v2, %v1190_v36  ;;  %vm636_vm7 = vcmp.eq.s32.totalorder %v325_v3, %v1994_v38  ;;  %vm605_vm12 = vcmp.eq.s32.totalorder %v195_v4, %v1994_v38 }
  0xd4   :  { %vm767_vm15 = vmand %vm636_vm7, %vm695_vm0  ;;  %92 = vbcast.lane.b32.xlu1 %v1895_v7, 368  ;;  %482 = vbcast.lane.b32.xlu0 %v1925_v17, 344 }
  0xd5   :  { %v1613_v8 = vsel %vm767_vm15, 1.0, %v1850_v1  ;;  %vm736_vm2 = vmand %vm605_vm12, %vm695_vm0 }
  0xd6   :  { %v1171_v10 = vadd.f32 %v1613_v8, %v1170_v45  ;;  %v1582_v12 = vsel %vm736_vm2, 1.0, %v1850_v1  ;;  %v65_v14 = vpop.permute.xlu1 %64  ;;  %v455_v16 = vpop.permute.xlu0 %454 }
  0xd7   :  { %v1130_v18 = vadd.f32 %v1582_v12, %v1129_v41  ;;  %vm574_vm10 = vcmp.eq.s32.totalorder %v65_v14, %v1994_v38  ;;  %vm667_vm5 = vcmp.eq.s32.totalorder %v455_v16, %v1994_v38 }
  0xd8   :  { %vm705_vm1 = vmand %vm574_vm10, %vm695_vm0  ;;  %289 = vbcast.lane.b32.xlu1 %v1907_v11, 360  ;;  %159 = vbcast.lane.b32.xlu0 %v1893_v6, 368 }
  0xd9   :  { %v1551_v20 = vsel %vm705_vm1, 1.0, %v1850_v1  ;;  %vm798_vm11 = vmand %vm667_vm5, %vm695_vm0 }
  0xda   :  { %v1089_v22 = vadd.f32 %v1551_v20, %v1088_v42  ;;  %v1644_v23 = vsel %vm798_vm11, 1.0, %v1850_v1  ;;  %v262_v24 = vpop.permute.xlu1 %261  ;;  %v132_v25 = vpop.permute.xlu0 %131 }
  0xdb   :  { %v1212_v21 = vadd.f32 %v1644_v23, %v1211_v58  ;;  %vm621_vm13 = vcmp.eq.s32.totalorder %v262_v24, %v1994_v38  ;;  %vm590_vm3 = vcmp.eq.s32.totalorder %v132_v25, %v1994_v38 }
  0xdc   :  { %vm752_vm6 = vmand %vm621_vm13, %vm695_vm0  ;;  %549 = vbcast.lane.b32.xlu1 %v1933_v19, 344  ;;  %419 = vbcast.lane.b32.xlu0 %v1919_v15, 352 }
  0xdd   :  { %v1598_v26 = vsel %vm752_vm6, 1.0, %v1850_v1  ;;  %vm721_vm4 = vmand %vm590_vm3, %vm695_vm0 }
  0xde   :  { %v1151_v27 = vadd.f32 %v1598_v26, %v1150_v56  ;;  %v1567_v28 = vsel %vm721_vm4, 1.0, %v1850_v1  ;;  %v522_v30 = vpop.permute.xlu1 %521  ;;  %v392_v31 = vpop.permute.xlu0 %391 }
  0xdf   :  { %v1110_v32 = vadd.f32 %v1567_v28, %v1109_v52  ;;  %vm683_vm8 = vcmp.eq.s32.totalorder %v522_v30, %v1994_v38  ;;  %vm652_vm14 = vcmp.eq.s32.totalorder %v392_v31, %v1994_v38 }
  0xe0   :  { %vm814_vm9 = vmand %vm683_vm8, %vm695_vm0  ;;  %356 = vbcast.lane.b32.xlu1 %v1911_v13, 360  ;;  %226 = vbcast.lane.b32.xlu0 %v1901_v9, 368 }
  0xe1   :  { %v1660_v33 = vsel %vm814_vm9, 1.0, %v1850_v1  ;;  %vm783_vm7 = vmand %vm652_vm14, %vm695_vm0 }
  0xe2   :  { %v1233_v34 = vadd.f32 %v1660_v33, %v1232_v0  ;;  %v1629_v29 = vsel %vm783_vm7, 1.0, %v1850_v1  ;;  %v329_v35 = vpop.permute.xlu1 %328  ;;  %v199_v36 = vpop.permute.xlu0 %198 }
  0xe3   :  { %v1192_v39 = vadd.f32 %v1629_v29, %v1191_v5  ;;  %vm637_vm12 = vcmp.eq.s32.totalorder %v329_v35, %v1994_v38  ;;  %vm606_vm15 = vcmp.eq.s32.totalorder %v199_v36, %v1994_v38 }
  0xe4   :  { %vm768_vm2 = vmand %vm637_vm12, %vm695_vm0  ;;  %96 = vbcast.lane.b32.xlu1 %v1895_v7, 376  ;;  %486 = vbcast.lane.b32.xlu0 %v1925_v17, 352 }
  0xe5   :  { %v1614_v40 = vsel %vm768_vm2, 1.0, %v1850_v1  ;;  %vm737_vm10 = vmand %vm606_vm15, %vm695_vm0 }
  0xe6   :  { %v1172_v43 = vadd.f32 %v1614_v40, %v1171_v10  ;;  %v1583_v37 = vsel %vm737_vm10, 1.0, %v1850_v1  ;;  %v69_v44 = vpop.permute.xlu1 %68  ;;  %v459_v46 = vpop.permute.xlu0 %458 }
  0xe7   :  { %v1131_v45 = vadd.f32 %v1583_v37, %v1130_v18  ;;  %vm575_vm5 = vcmp.eq.s32.totalorder %v69_v44, %v1994_v38  ;;  %vm668_vm1 = vcmp.eq.s32.totalorder %v459_v46, %v1994_v38 }
  0xe8   :  { %vm706_vm11 = vmand %vm575_vm5, %vm695_vm0  ;;  %293 = vbcast.lane.b32.xlu1 %v1907_v11, 368  ;;  %163 = vbcast.lane.b32.xlu0 %v1893_v6, 376  ;;  %v1682_v6 = vld [vmem:[%s2916_s1] sm:$0xff]  }
  0xe9   :  { %v1552_v7 = vsel %vm706_vm11, 1.0, %v1850_v1  ;;  %vm799_vm13 = vmand %vm668_vm1, %vm695_vm0  ;;  %1803 = vmatpush3.bf16.msra.mxu0 %v1682_v6 }
  0xea   :  { %v1090_v47 = vadd.f32 %v1552_v7, %v1089_v22  ;;  %v1645_v48 = vsel %vm799_vm13, 1.0, %v1850_v1  ;;  %v266_v49 = vpop.permute.xlu1 %265  ;;  %v136_v50 = vpop.permute.xlu0 %135  ;;  %1804 = vmatprep.subr.bf16.mxu0 %v1851_v51  ;;  %v1716_v22 = vld [vmem:[%s2916_s1 + $0x20] sm:$0xff]  }
  0xeb   :  { %v1213_v41 = vadd.f32 %v1645_v48, %v1212_v21  ;;  %vm622_vm3 = vcmp.eq.s32.totalorder %v266_v49, %v1994_v38  ;;  %vm591_vm6 = vcmp.eq.s32.totalorder %v136_v50, %v1994_v38 }
  0xec   :  { %vm753_vm4 = vmand %vm622_vm3, %vm695_vm0  ;;  %553 = vbcast.lane.b32.xlu1 %v1933_v19, 352  ;;  %423 = vbcast.lane.b32.xlu0 %v1919_v15, 360 }
  0xed   :  { %v1599_v53 = vsel %vm753_vm4, 1.0, %v1850_v1  ;;  %vm722_vm8 = vmand %vm591_vm6, %vm695_vm0  ;;  %1806 = vmatpush3.bf16.msra.mxu0 %v1713_v59 }
  0xee   :  { %v1152_v42 = vadd.f32 %v1599_v53, %v1151_v27  ;;  %v1568_v54 = vsel %vm722_vm8, 1.0, %v1850_v1  ;;  %v526_v55 = vpop.permute.xlu1 %525  ;;  %v396_v57 = vpop.permute.xlu0 %395  ;;  %1807 = vmatprep.subr.bf16.mxu0 %v1851_v51 }
  0xef   :  { %v1111_v58 = vadd.f32 %v1568_v54, %v1110_v32  ;;  %vm684_vm14 = vcmp.eq.s32.totalorder %v526_v55, %v1994_v38  ;;  %vm653_vm9 = vcmp.eq.s32.totalorder %v396_v57, %v1994_v38 }
  0xf0   :  { %vm815_vm7 = vmand %vm684_vm14, %vm695_vm0  ;;  %360 = vbcast.lane.b32.xlu1 %v1911_v13, 368  ;;  %230 = vbcast.lane.b32.xlu0 %v1901_v9, 376  ;;  %v1714_v9 = vld [vmem:[%s2916_s1 + $0x10] sm:$0xff]  }
  0xf1   :  { %v1661_v56 = vsel %vm815_vm7, 1.0, %v1850_v1  ;;  %vm784_vm12 = vmand %vm653_vm9, %vm695_vm0  ;;  %1809 = vmatpush3.bf16.msra.mxu0 %v1714_v9 }
  0xf2   :  { %v1234_v60 = vadd.f32 %v1661_v56, %v1233_v34  ;;  %v1630_v61 = vsel %vm784_vm12, 1.0, %v1850_v1  ;;  %v333_v62 = vpop.permute.xlu1 %332  ;;  %v203_v52 = vpop.permute.xlu0 %202  ;;  %1810 = vmatprep.subr.bf16.mxu0 %v1851_v51 }
  0xf3   :  { %v1193_v63 = vadd.f32 %v1630_v61, %v1192_v39  ;;  %vm638_vm15 = vcmp.eq.s32.totalorder %v333_v62, %v1994_v38  ;;  %vm607_vm2 = vcmp.eq.s32.totalorder %v203_v52, %v1994_v38 }
  0xf4   :  { %vm769_vm10 = vmand %vm638_vm15, %vm695_vm0  ;;  %297 = vbcast.lane.b32.xlu1 %v1907_v11, 376  ;;  %490 = vbcast.lane.b32.xlu0 %v1925_v17, 360  ;;  %v1715_v11 = vld [vmem:[%s2916_s1 + $0x18] sm:$0xff]  }
  0xf5   :  { %v1615_v0 = vsel %vm769_vm10, 1.0, %v1850_v1  ;;  %vm738_vm5 = vmand %vm607_vm2, %vm695_vm0  ;;  %1812 = vmatpush3.bf16.msra.mxu0 %v1715_v11 }
  0xf6   :  { %v1173_v2 = vadd.f32 %v1615_v0, %v1172_v43  ;;  %v1584_v3 = vsel %vm738_vm5, 1.0, %v1850_v1  ;;  %v73_v4 = vpop.permute.xlu1 %72  ;;  %v463_v5 = vpop.permute.xlu0 %462  ;;  %1813 = vmatprep.subr.bf16.mxu0 %v1851_v51  ;;  %v1719_v43 = vld [vmem:[%s2916_s1 + $0x38] sm:$0xff]  }
  0xf7   :  { %v2576_v8 = vadd.f32 %v1584_v3, %v1131_v45  ;;  %vm576_vm1 = vcmp.eq.s32.totalorder %v73_v4, %v1994_v38  ;;  %vm669_vm11 = vcmp.eq.s32.totalorder %v463_v5, %v1994_v38 }
  0xf8   :  { %vm707_vm13 = vmand %vm576_vm1, %vm695_vm0  ;;  %557 = vbcast.lane.b32.xlu1 %v1933_v19, 360  ;;  %427 = vbcast.lane.b32.xlu0 %v1919_v15, 368 }
  0xf9   :  { %v1553_v10 = vsel %vm707_vm13, 1.0, %v1850_v1  ;;  %vm800_vm3 = vmand %vm669_vm11, %vm695_vm0  ;;  %1815 = vmatpush3.bf16.msra.mxu0 %v1716_v22  ;;  %vm1852_vm11 = vmmov 0  }
  0xfa   :  { %v1091_v12 = vadd.f32 %v1553_v10, %v1090_v47  ;;  %v1646_v14 = vsel %vm800_vm3, 1.0, %v1850_v1  ;;  %v270_v16 = vpop.permute.xlu1 %269  ;;  %v140_v18 = vpop.permute.xlu0 %139  ;;  %1816 = vmatprep.subr.bf16.mxu0 %v1851_v51  ;;  %1778 = vmatprep.mubr.msk.f32.mxu0 %vm1852_vm11, %v1850_v1 }
  0xfb   :  { %v1214_v20 = vadd.f32 %v1646_v14, %v1213_v41  ;;  %vm623_vm6 = vcmp.eq.s32.totalorder %v270_v16, %v1994_v38  ;;  %vm592_vm4 = vcmp.eq.s32.totalorder %v140_v18, %v1994_v38  ;;  %1797 = vmatprep.mubr.msk.bf16.mxu1 %vm1852_vm11, %v1850_v1 }
  0xfc   :  { %vm754_vm8 = vmand %vm623_vm6, %vm695_vm0  ;;  %494 = vbcast.lane.b32.xlu1 %v1925_v17, 368  ;;  %364 = vbcast.lane.b32.xlu0 %v1911_v13, 376  ;;  %v1717_v13 = vld [vmem:[%s2916_s1 + $0x28] sm:$0xff]  }
  0xfd   :  { %v1600_v23 = vsel %vm754_vm8, 1.0, %v1850_v1  ;;  %vm723_vm14 = vmand %vm592_vm4, %vm695_vm0  ;;  %1818 = vmatpush3.bf16.msra.mxu0 %v1717_v13 }
  0xfe   :  { %v1153_v24 = vadd.f32 %v1600_v23, %v1152_v42  ;;  %v1569_v25 = vsel %vm723_vm14, 1.0, %v1850_v1  ;;  %v530_v21 = vpop.permute.xlu1 %529  ;;  %v400_v26 = vpop.permute.xlu0 %399  ;;  %1819 = vmatprep.subr.bf16.mxu0 %v1851_v51 }
  0xff   :  { %v1112_v27 = vadd.f32 %v1569_v25, %v1111_v58  ;;  %vm685_vm9 = vcmp.eq.s32.totalorder %v530_v21, %v1994_v38  ;;  %vm654_vm7 = vcmp.eq.s32.totalorder %v400_v26, %v1994_v38 }
 0x100   :  { %vm816_vm12 = vmand %vm685_vm9, %vm695_vm0  ;;  %561 = vbcast.lane.b32.xlu1 %v1933_v19, 368  ;;  %431 = vbcast.lane.b32.xlu0 %v1919_v15, 376  ;;  %v1718_v15 = vld [vmem:[%s2916_s1 + $0x30] sm:$0xff]  }
 0x101   :  { %v1662_v28 = vsel %vm816_vm12, 1.0, %v1850_v1  ;;  %vm785_vm15 = vmand %vm654_vm7, %vm695_vm0  ;;  %1821 = vmatpush3.bf16.msra.mxu0 %v1718_v15 }
 0x102   :  { %v1235_v30 = vadd.f32 %v1662_v28, %v1234_v60  ;;  %v1631_v31 = vsel %vm785_vm15, 1.0, %v1850_v1  ;;  %v337_v32 = vpop.permute.xlu1 %336  ;;  %v207_v33 = vpop.permute.xlu0 %206  ;;  %1822 = vmatprep.subr.bf16.mxu0 %v1851_v51 }
 0x103   :  { %v1194_v34 = vadd.f32 %v1631_v31, %v1193_v63  ;;  %vm639_vm2 = vcmp.eq.s32.totalorder %v337_v32, %v1994_v38  ;;  %vm608_vm10 = vcmp.eq.s32.totalorder %v207_v33, %v1994_v38 }
 0x104   :  { %vm770_vm5 = vmand %vm639_vm2, %vm695_vm0  ;;  %565 = vbcast.lane.b32.xlu1 %v1933_v19, 376  ;;  %498 = vbcast.lane.b32.xlu0 %v1925_v17, 376 }
 0x105   :  { %v1616_v29 = vsel %vm770_vm5, 1.0, %v1850_v1  ;;  %vm739_vm1 = vmand %vm608_vm10, %vm695_vm0  ;;  %1824 = vmatpush3.bf16.msra.mxu0 %v1719_v43 }
 0x106   :  { %v1174_v35 = vadd.f32 %v1616_v29, %v1173_v2  ;;  %v1585_v36 = vsel %vm739_vm1, 1.0, %v1850_v1  ;;  %v77_v39 = vpop.permute.xlu1 %76  ;;  %v467_v40 = vpop.permute.xlu0 %466 }
 0x107   :  { %v1133_v17 = vadd.f32 %v1585_v36, %v2576_v8  ;;  %vm577_vm13 = vcmp.eq.s32.totalorder %v77_v39, %v1994_v38  ;;  %vm670_vm3 = vcmp.eq.s32.totalorder %v467_v40, %v1994_v38 }
 0x108   :  { %vm708_vm6 = vmand %vm577_vm13, %vm695_vm0 }
 0x109   :  { %v1554_v19 = vsel %vm708_vm6, 1.0, %v1850_v1  ;;  %vm801_vm4 = vmand %vm670_vm3, %vm695_vm0 }
 0x10a   :  { %v1092_v37 = vadd.f32 %v1554_v19, %v1091_v12  ;;  %v1647_v44 = vsel %vm801_vm4, 1.0, %v1850_v1  ;;  %v274_v46 = vpop.permute.xlu1 %273  ;;  %v144_v45 = vpop.permute.xlu0 %143 }
 0x10b   :  { %v1215_v7 = vadd.f32 %v1647_v44, %v1214_v20  ;;  %vm624_vm8 = vcmp.eq.s32.totalorder %v274_v46, %v1994_v38  ;;  %vm593_vm14 = vcmp.eq.s32.totalorder %v144_v45, %v1994_v38 }
 0x10c   :  { %vm755_vm9 = vmand %vm624_vm8, %vm695_vm0 }
 0x10d   :  { %v1601_v47 = vsel %vm755_vm9, 1.0, %v1850_v1  ;;  %vm724_vm7 = vmand %vm593_vm14, %vm695_vm0 }
 0x10e   :  { %v1154_v48 = vadd.f32 %v1601_v47, %v1153_v24  ;;  %v1570_v49 = vsel %vm724_vm7, 1.0, %v1850_v1  ;;  %v534_v50 = vpop.permute.xlu1 %533  ;;  %v404_v41 = vpop.permute.xlu0 %403 }
 0x10f   :  { %v1113_v51 = vadd.f32 %v1570_v49, %v1112_v27  ;;  %vm686_vm12 = vcmp.eq.s32.totalorder %v534_v50, %v1994_v38  ;;  %vm655_vm15 = vcmp.eq.s32.totalorder %v404_v41, %v1994_v38 }
 0x110   :  { %vm817_vm2 = vmand %vm686_vm12, %vm695_vm0 }
 0x111   :  { %v1663_v6 = vsel %vm817_vm2, 1.0, %v1850_v1  ;;  %vm786_vm10 = vmand %vm655_vm15, %vm695_vm0 }
 0x112   :  { %v1236_v53 = vadd.f32 %v1663_v6, %v1235_v30  ;;  %v1632_v42 = vsel %vm786_vm10, 1.0, %v1850_v1  ;;  %v341_v54 = vpop.permute.xlu1 %340  ;;  %v211_v55 = vpop.permute.xlu0 %210 }
 0x113   :  { %v1195_v57 = vadd.f32 %v1632_v42, %v1194_v34  ;;  %vm640_vm5 = vcmp.eq.s32.totalorder %v341_v54, %v1994_v38  ;;  %vm609_vm1 = vcmp.eq.s32.totalorder %v211_v55, %v1994_v38 }
 0x114   :  { %vm771_vm11 = vmand %vm640_vm5, %vm695_vm0 }
 0x115   :  { %v1617_v58 = vsel %vm771_vm11, 1.0, %v1850_v1  ;;  %vm740_vm13 = vmand %vm609_vm1, %vm695_vm0 }
 0x116   :  { %v1175_v59 = vadd.f32 %v1617_v58, %v1174_v35  ;;  %v1586_v56 = vsel %vm740_vm13, 1.0, %v1850_v1  ;;  %v81_v60 = vpop.permute.xlu1 %80  ;;  %v471_v61 = vpop.permute.xlu0 %470 }
 0x117   :  { %v1134_v62 = vadd.f32 %v1586_v56, %v1133_v17  ;;  %vm578_vm3 = vcmp.eq.s32.totalorder %v81_v60, %v1994_v38  ;;  %vm671_vm6 = vcmp.eq.s32.totalorder %v471_v61, %v1994_v38 }
 0x118   :  { %vm709_vm4 = vmand %vm578_vm3, %vm695_vm0 }
 0x119   :  { %v1555_v52 = vsel %vm709_vm4, 1.0, %v1850_v1  ;;  %vm802_vm8 = vmand %vm671_vm6, %vm695_vm0 }
 0x11a   :  { %v1093_v63 = vadd.f32 %v1555_v52, %v1092_v37  ;;  %v1648_v9 = vsel %vm802_vm8, 1.0, %v1850_v1  ;;  %v278_v0 = vpop.permute.xlu1 %277  ;;  %v148_v2 = vpop.permute.xlu0 %147 }
 0x11b   :  { %v1216_v3 = vadd.f32 %v1648_v9, %v1215_v7  ;;  %vm625_vm14 = vcmp.eq.s32.totalorder %v278_v0, %v1994_v38  ;;  %vm594_vm9 = vcmp.eq.s32.totalorder %v148_v2, %v1994_v38 }
 0x11c   :  { %vm756_vm7 = vmand %vm625_vm14, %vm695_vm0 }
 0x11d   :  { %v1602_v4 = vsel %vm756_vm7, 1.0, %v1850_v1  ;;  %vm725_vm12 = vmand %vm594_vm9, %vm695_vm0 }
 0x11e   :  { %v1155_v5 = vadd.f32 %v1602_v4, %v1154_v48  ;;  %v1571_v8 = vsel %vm725_vm12, 1.0, %v1850_v1  ;;  %v538_v11 = vpop.permute.xlu1 %537  ;;  %v408_v10 = vpop.permute.xlu0 %407 }
 0x11f   :  { %v1114_v12 = vadd.f32 %v1571_v8, %v1113_v51  ;;  %vm687_vm15 = vcmp.eq.s32.totalorder %v538_v11, %v1994_v38  ;;  %vm656_vm2 = vcmp.eq.s32.totalorder %v408_v10, %v1994_v38 }
 0x120   :  { %vm818_vm10 = vmand %vm687_vm15, %vm695_vm0 }
 0x121   :  { %v1664_v14 = vsel %vm818_vm10, 1.0, %v1850_v1  ;;  %vm787_vm5 = vmand %vm656_vm2, %vm695_vm0 }
 0x122   :  { %v1237_v16 = vadd.f32 %v1664_v14, %v1236_v53  ;;  %v1633_v18 = vsel %vm787_vm5, 1.0, %v1850_v1  ;;  %v345_v20 = vpop.permute.xlu1 %344  ;;  %v215_v22 = vpop.permute.xlu0 %214 }
 0x123   :  { %v1196_v23 = vadd.f32 %v1633_v18, %v1195_v57  ;;  %vm641_vm1 = vcmp.eq.s32.totalorder %v345_v20, %v1994_v38  ;;  %vm610_vm11 = vcmp.eq.s32.totalorder %v215_v22, %v1994_v38 }
 0x124   :  { %vm772_vm13 = vmand %vm641_vm1, %vm695_vm0 }
 0x125   :  { %v1618_v24 = vsel %vm772_vm13, 1.0, %v1850_v1  ;;  %vm741_vm3 = vmand %vm610_vm11, %vm695_vm0 }
 0x126   :  { %v1176_v25 = vadd.f32 %v1618_v24, %v1175_v59  ;;  %v1587_v21 = vsel %vm741_vm3, 1.0, %v1850_v1  ;;  %v85_v26 = vpop.permute.xlu1 %84  ;;  %v475_v27 = vpop.permute.xlu0 %474 }
 0x127   :  { %v1135_v13 = vadd.f32 %v1587_v21, %v1134_v62  ;;  %vm579_vm6 = vcmp.eq.s32.totalorder %v85_v26, %v1994_v38  ;;  %vm672_vm4 = vcmp.eq.s32.totalorder %v475_v27, %v1994_v38 }
 0x128   :  { %vm710_vm8 = vmand %vm579_vm6, %vm695_vm0 }
 0x129   :  { %v1556_v28 = vsel %vm710_vm8, 1.0, %v1850_v1  ;;  %vm803_vm14 = vmand %vm672_vm4, %vm695_vm0 }
 0x12a   :  { %v1094_v30 = vadd.f32 %v1556_v28, %v1093_v63  ;;  %v1649_v31 = vsel %vm803_vm14, 1.0, %v1850_v1  ;;  %v282_v32 = vpop.permute.xlu1 %281  ;;  %v152_v33 = vpop.permute.xlu0 %151 }
 0x12b   :  { %v1217_v34 = vadd.f32 %v1649_v31, %v1216_v3  ;;  %vm626_vm9 = vcmp.eq.s32.totalorder %v282_v32, %v1994_v38  ;;  %vm595_vm7 = vcmp.eq.s32.totalorder %v152_v33, %v1994_v38 }
 0x12c   :  { %vm757_vm12 = vmand %vm626_vm9, %vm695_vm0 }
 0x12d   :  { %v1603_v15 = vsel %vm757_vm12, 1.0, %v1850_v1  ;;  %vm726_vm15 = vmand %vm595_vm7, %vm695_vm0 }
 0x12e   :  { %v1156_v29 = vadd.f32 %v1603_v15, %v1155_v5  ;;  %v1572_v35 = vsel %vm726_vm15, 1.0, %v1850_v1  ;;  %v542_v36 = vpop.permute.xlu1 %541  ;;  %v412_v39 = vpop.permute.xlu0 %411 }
 0x12f   :  { %v1115_v40 = vadd.f32 %v1572_v35, %v1114_v12  ;;  %vm688_vm2 = vcmp.eq.s32.totalorder %v542_v36, %v1994_v38  ;;  %vm657_vm10 = vcmp.eq.s32.totalorder %v412_v39, %v1994_v38 }
 0x130   :  { %vm819_vm5 = vmand %vm688_vm2, %vm695_vm0 }
 0x131   :  { %v1665_v43 = vsel %vm819_vm5, 1.0, %v1850_v1  ;;  %vm788_vm1 = vmand %vm657_vm10, %vm695_vm0 }
 0x132   :  { %v1238_v17 = vadd.f32 %v1665_v43, %v1237_v16  ;;  %v1634_v19 = vsel %vm788_vm1, 1.0, %v1850_v1  ;;  %v349_v37 = vpop.permute.xlu1 %348  ;;  %v219_v44 = vpop.permute.xlu0 %218 }
 0x133   :  { %v1197_v46 = vadd.f32 %v1634_v19, %v1196_v23  ;;  %vm642_vm11 = vcmp.eq.s32.totalorder %v349_v37, %v1994_v38  ;;  %vm611_vm13 = vcmp.eq.s32.totalorder %v219_v44, %v1994_v38 }
 0x134   :  { %vm773_vm3 = vmand %vm642_vm11, %vm695_vm0 }
 0x135   :  { %v1619_v45 = vsel %vm773_vm3, 1.0, %v1850_v1  ;;  %vm742_vm6 = vmand %vm611_vm13, %vm695_vm0 }
 0x136   :  { %v1177_v7 = vadd.f32 %v1619_v45, %v1176_v25  ;;  %v1588_v47 = vsel %vm742_vm6, 1.0, %v1850_v1  ;;  %v89_v48 = vpop.permute.xlu1 %88  ;;  %v479_v49 = vpop.permute.xlu0 %478 }
 0x137   :  { %v1136_v50 = vadd.f32 %v1588_v47, %v1135_v13  ;;  %vm580_vm4 = vcmp.eq.s32.totalorder %v89_v48, %v1994_v38  ;;  %vm673_vm8 = vcmp.eq.s32.totalorder %v479_v49, %v1994_v38 }
 0x138   :  { %vm711_vm14 = vmand %vm580_vm4, %vm695_vm0 }
 0x139   :  { %v1557_v41 = vsel %vm711_vm14, 1.0, %v1850_v1  ;;  %vm804_vm9 = vmand %vm673_vm8, %vm695_vm0 }
 0x13a   :  { %v1095_v51 = vadd.f32 %v1557_v41, %v1094_v30  ;;  %v1650_v6 = vsel %vm804_vm9, 1.0, %v1850_v1  ;;  %v286_v53 = vpop.permute.xlu1 %285  ;;  %v156_v42 = vpop.permute.xlu0 %155 }
 0x13b   :  { %v1218_v54 = vadd.f32 %v1650_v6, %v1217_v34  ;;  %vm627_vm7 = vcmp.eq.s32.totalorder %v286_v53, %v1994_v38  ;;  %vm596_vm12 = vcmp.eq.s32.totalorder %v156_v42, %v1994_v38 }
 0x13c   :  { %vm758_vm15 = vmand %vm627_vm7, %vm695_vm0 }
 0x13d   :  { %v1604_v55 = vsel %vm758_vm15, 1.0, %v1850_v1  ;;  %vm727_vm2 = vmand %vm596_vm12, %vm695_vm0 }
 0x13e   :  { %v1157_v57 = vadd.f32 %v1604_v55, %v1156_v29  ;;  %v1573_v58 = vsel %vm727_vm2, 1.0, %v1850_v1  ;;  %v546_v59 = vpop.permute.xlu1 %545  ;;  %v416_v56 = vpop.permute.xlu0 %415 }
 0x13f   :  { %v1116_v60 = vadd.f32 %v1573_v58, %v1115_v40  ;;  %vm689_vm10 = vcmp.eq.s32.totalorder %v546_v59, %v1994_v38  ;;  %vm658_vm5 = vcmp.eq.s32.totalorder %v416_v56, %v1994_v38 }
 0x140   :  { %vm820_vm1 = vmand %vm689_vm10, %vm695_vm0 }
 0x141   :  { %v1666_v61 = vsel %vm820_vm1, 1.0, %v1850_v1  ;;  %vm789_vm11 = vmand %vm658_vm5, %vm695_vm0 }
 0x142   :  { %v1239_v62 = vadd.f32 %v1666_v61, %v1238_v17  ;;  %v1635_v52 = vsel %vm789_vm11, 1.0, %v1850_v1  ;;  %v353_v63 = vpop.permute.xlu1 %352  ;;  %v223_v9 = vpop.permute.xlu0 %222 }
 0x143   :  { %v1198_v0 = vadd.f32 %v1635_v52, %v1197_v46  ;;  %vm643_vm13 = vcmp.eq.s32.totalorder %v353_v63, %v1994_v38  ;;  %vm612_vm3 = vcmp.eq.s32.totalorder %v223_v9, %v1994_v38 }
 0x144   :  { %vm774_vm6 = vmand %vm643_vm13, %vm695_vm0 }
 0x145   :  { %v1620_v2 = vsel %vm774_vm6, 1.0, %v1850_v1  ;;  %vm743_vm4 = vmand %vm612_vm3, %vm695_vm0 }
 0x146   :  { %v1178_v3 = vadd.f32 %v1620_v2, %v1177_v7  ;;  %v1589_v4 = vsel %vm743_vm4, 1.0, %v1850_v1  ;;  %v93_v5 = vpop.permute.xlu1 %92  ;;  %v483_v8 = vpop.permute.xlu0 %482 }
 0x147   :  { %v1137_v11 = vadd.f32 %v1589_v4, %v1136_v50  ;;  %vm581_vm8 = vcmp.eq.s32.totalorder %v93_v5, %v1994_v38  ;;  %vm674_vm14 = vcmp.eq.s32.totalorder %v483_v8, %v1994_v38 }
 0x148   :  { %vm712_vm9 = vmand %vm581_vm8, %vm695_vm0 }
 0x149   :  { %v1558_v10 = vsel %vm712_vm9, 1.0, %v1850_v1  ;;  %vm805_vm7 = vmand %vm674_vm14, %vm695_vm0 }
 0x14a   :  { %v1096_v12 = vadd.f32 %v1558_v10, %v1095_v51  ;;  %v1651_v14 = vsel %vm805_vm7, 1.0, %v1850_v1  ;;  %v290_v16 = vpop.permute.xlu1 %289  ;;  %v160_v18 = vpop.permute.xlu0 %159 }
 0x14b   :  { %v1219_v20 = vadd.f32 %v1651_v14, %v1218_v54  ;;  %vm628_vm12 = vcmp.eq.s32.totalorder %v290_v16, %v1994_v38  ;;  %vm597_vm15 = vcmp.eq.s32.totalorder %v160_v18, %v1994_v38 }
 0x14c   :  { %vm759_vm2 = vmand %vm628_vm12, %vm695_vm0 }
 0x14d   :  { %v1605_v22 = vsel %vm759_vm2, 1.0, %v1850_v1  ;;  %vm728_vm10 = vmand %vm597_vm15, %vm695_vm0 }
 0x14e   :  { %v1158_v23 = vadd.f32 %v1605_v22, %v1157_v57  ;;  %v1574_v24 = vsel %vm728_vm10, 1.0, %v1850_v1  ;;  %v550_v25 = vpop.permute.xlu1 %549  ;;  %v420_v21 = vpop.permute.xlu0 %419 }
 0x14f   :  { %v1117_v26 = vadd.f32 %v1574_v24, %v1116_v60  ;;  %vm690_vm5 = vcmp.eq.s32.totalorder %v550_v25, %v1994_v38  ;;  %vm659_vm1 = vcmp.eq.s32.totalorder %v420_v21, %v1994_v38 }
 0x150   :  { %vm821_vm11 = vmand %vm690_vm5, %vm695_vm0 }
 0x151   :  { %v1667_v27 = vsel %vm821_vm11, 1.0, %v1850_v1  ;;  %vm790_vm13 = vmand %vm659_vm1, %vm695_vm0 }
 0x152   :  { %v1240_v13 = vadd.f32 %v1667_v27, %v1239_v62  ;;  %v1636_v28 = vsel %vm790_vm13, 1.0, %v1850_v1  ;;  %v357_v30 = vpop.permute.xlu1 %356  ;;  %v227_v31 = vpop.permute.xlu0 %226 }
 0x153   :  { %v1199_v32 = vadd.f32 %v1636_v28, %v1198_v0  ;;  %vm644_vm3 = vcmp.eq.s32.totalorder %v357_v30, %v1994_v38  ;;  %vm613_vm6 = vcmp.eq.s32.totalorder %v227_v31, %v1994_v38 }
 0x154   :  { %vm775_vm4 = vmand %vm644_vm3, %vm695_vm0 }
 0x155   :  { %v1621_v33 = vsel %vm775_vm4, 1.0, %v1850_v1  ;;  %vm744_vm8 = vmand %vm613_vm6, %vm695_vm0 }
 0x156   :  { %v1179_v34 = vadd.f32 %v1621_v33, %v1178_v3  ;;  %v1590_v15 = vsel %vm744_vm8, 1.0, %v1850_v1  ;;  %v97_v29 = vpop.permute.xlu1 %96  ;;  %v487_v35 = vpop.permute.xlu0 %486 }
 0x157   :  { %v1138_v36 = vadd.f32 %v1590_v15, %v1137_v11  ;;  %vm582_vm14 = vcmp.eq.s32.totalorder %v97_v29, %v1994_v38  ;;  %vm675_vm9 = vcmp.eq.s32.totalorder %v487_v35, %v1994_v38 }
 0x158   :  { %vm713_vm7 = vmand %vm582_vm14, %vm695_vm0 }
 0x159   :  { %v1559_v39 = vsel %vm713_vm7, 1.0, %v1850_v1  ;;  %vm806_vm12 = vmand %vm675_vm9, %vm695_vm0 }
 0x15a   :  { %v1097_v40 = vadd.f32 %v1559_v39, %v1096_v12  ;;  %v1652_v43 = vsel %vm806_vm12, 1.0, %v1850_v1  ;;  %v294_v17 = vpop.permute.xlu1 %293  ;;  %v164_v19 = vpop.permute.xlu0 %163 }
 0x15b   :  { %v1220_v37 = vadd.f32 %v1652_v43, %v1219_v20  ;;  %vm629_vm15 = vcmp.eq.s32.totalorder %v294_v17, %v1994_v38  ;;  %vm598_vm2 = vcmp.eq.s32.totalorder %v164_v19, %v1994_v38 }
 0x15c   :  { %v1098_v44 = vrot.slane %v1097_v40, 4  ;;  %vm760_vm10 = vmand %vm629_vm15, %vm695_vm0 }
 0x15d   :  { %v1606_v46 = vsel %vm760_vm10, 1.0, %v1850_v1  ;;  %vm729_vm5 = vmand %vm598_vm2, %vm695_vm0  ;;  %vm1259_vm2 = vcmask 1041409  }
 0x15e   :  { %v1099_v45 = vadd.f32 %v1098_v44, %v1097_v40  ;;  %v1159_v7 = vadd.f32 %v1606_v46, %v1158_v23  ;;  %v1575_v47 = vsel %vm729_vm5, 1.0, %v1850_v1  ;;  %v554_v48 = vpop.permute.xlu1 %553  ;;  %v424_v49 = vpop.permute.xlu0 %423 }
 0x15f   :  { %v1118_v50 = vadd.f32 %v1575_v47, %v1117_v26  ;;  %vm691_vm1 = vcmp.eq.s32.totalorder %v554_v48, %v1994_v38  ;;  %vm660_vm11 = vcmp.eq.s32.totalorder %v424_v49, %v1994_v38 }
 0x160   :  { %v1100_v41 = vrot.slane %v1099_v45, 2  ;;  %vm822_vm13 = vmand %vm691_vm1, %vm695_vm0 }
 0x161   :  { %v1119_v51 = vrot.slane %v1118_v50, 4  ;;  %v1668_v6 = vsel %vm822_vm13, 1.0, %v1850_v1  ;;  %vm791_vm3 = vmand %vm660_vm11, %vm695_vm0 }
 0x162   :  { %v1101_v53 = vadd.f32 %v1100_v41, %v1099_v45  ;;  %v1241_v42 = vadd.f32 %v1668_v6, %v1240_v13  ;;  %v1637_v54 = vsel %vm791_vm3, 1.0, %v1850_v1  ;;  %v361_v55 = vpop.permute.xlu1 %360  ;;  %v231_v57 = vpop.permute.xlu0 %230 }
 0x163   :  { %v1120_v58 = vadd.f32 %v1119_v51, %v1118_v50  ;;  %v1200_v59 = vadd.f32 %v1637_v54, %v1199_v32  ;;  %vm645_vm6 = vcmp.eq.s32.totalorder %v361_v55, %v1994_v38  ;;  %vm614_vm4 = vcmp.eq.s32.totalorder %v231_v57, %v1994_v38 }
 0x164   :  { %vm776_vm8 = vmand %vm645_vm6, %vm695_vm0  ;;  %v1102_v61 = vrot.slane %v1101_v53, 1 }
 0x165   :  { %v1121_v56 = vrot.slane %v1120_v58, 2  ;;  %v1622_v60 = vsel %vm776_vm8, 1.0, %v1850_v1  ;;  %vm745_vm14 = vmand %vm614_vm4, %vm695_vm0  ;;  %vm1261_vm8 = vcmask 1042434  }
 0x166   :  { %v1180_v62 = vadd.f32 %v1622_v60, %v1179_v34  ;;  %v1591_v52 = vsel %vm745_vm14, 1.0, %v1850_v1  ;;  %v298_v63 = vpop.permute.xlu1 %297  ;;  %v491_v9 = vpop.permute.xlu0 %490  ;;  %v1103_v8 = vadd.f32 %v1102_v61, %v1101_v53 }
 0x167   :  { %v1122_v0 = vadd.f32 %v1121_v56, %v1120_v58  ;;  %v1139_v2 = vadd.f32 %v1591_v52, %v1138_v36  ;;  %vm630_vm9 = vcmp.eq.s32.totalorder %v298_v63, %v1994_v38  ;;  %vm676_vm7 = vcmp.eq.s32.totalorder %v491_v9, %v1994_v38 }
 0x168   :  { %vm761_vm12 = vmand %vm630_vm9, %vm695_vm0 }
 0x169   :  { %v1123_v3 = vrot.slane %v1122_v0, 1  ;;  %v1140_v4 = vrot.slane %v1139_v2, 4  ;;  %v1607_v5 = vsel %vm761_vm12, 1.0, %v1850_v1  ;;  %vm807_vm15 = vmand %vm676_vm7, %vm695_vm0 }
 0x16a   :  { %v1160_v11 = vadd.f32 %v1607_v5, %v1159_v7  ;;  %v1653_v10 = vsel %vm807_vm15, 1.0, %v1850_v1  ;;  %v558_v12 = vpop.permute.xlu1 %557  ;;  %v428_v14 = vpop.permute.xlu0 %427  ;;  %vm1263_vm15 = vcmask 1043459  }
 0x16b   :  { %v1124_v16 = vadd.f32 %v1123_v3, %v1122_v0  ;;  %v1141_v18 = vadd.f32 %v1140_v4, %v1139_v2  ;;  %v1221_v20 = vadd.f32 %v1653_v10, %v1220_v37  ;;  %vm692_vm10 = vcmp.eq.s32.totalorder %v558_v12, %v1994_v38 }
 0x16c   :  { %v1161_v22 = vrot.slane %v1160_v11, 4  ;;  %vm823_vm5 = vmand %vm692_vm10, %vm695_vm0  ;;  %vm661_vm1 = vcmp.eq.s32.totalorder %v428_v14, %v1994_v38 }
 0x16d   :  { %v1260_v23 = vsel %vm1259_vm2, %v1124_v16, %v1103_v8  ;;  %v1142_v24 = vrot.slane %v1141_v18, 2  ;;  %v1669_v25 = vsel %vm823_vm5, 1.0, %v1850_v1  ;;  %vm792_vm11 = vmand %vm661_vm1, %vm695_vm0 }
 0x16e   :  { %v1162_v21 = vadd.f32 %v1161_v22, %v1160_v11  ;;  %v1242_v26 = vadd.f32 %v1669_v25, %v1241_v42  ;;  %v1638_v27 = vsel %vm792_vm11, 1.0, %v1850_v1  ;;  %v495_v13 = vpop.permute.xlu1 %494  ;;  %v365_v28 = vpop.permute.xlu0 %364  ;;  %vm1265_vm11 = vcmask 1044484   ;;  %v1828_v22 = vld [vmem:[%s2917_s2] sm:$0xff]   ;;  %v1831_v25 = vld [vmem:[%s2917_s2 + $0x18] sm:$0xff]  }
 0x16f   :  { %v1143_v30 = vadd.f32 %v1142_v24, %v1141_v18  ;;  %v1201_v31 = vadd.f32 %v1638_v27, %v1200_v59  ;;  %vm677_vm13 = vcmp.eq.s32.totalorder %v495_v13, %v1994_v38  ;;  %vm646_vm3 = vcmp.eq.s32.totalorder %v365_v28, %v1994_v38  ;;  %1782 = vmatpush3.bf16.msra.mxu1 %v1828_v22  ;;  %v1830_v24 = vld [vmem:[%s2917_s2 + $0x10] sm:$0xff]   ;;  %v1835_v13 = vld [vmem:[%s2917_s2 + $0x38] sm:$0xff]  }
 0x170   :  { %v1163_v32 = vrot.slane %v1162_v21, 2  ;;  %vm808_vm6 = vmand %vm677_vm13, %vm695_vm0  ;;  %vm1269_vm13 = vcmask 1046534   ;;  %1783 = vmatprep.subr.bf16.mxu1 %v1850_v1  ;;  %v1834_v27 = vld [vmem:[%s2917_s2 + $0x30] sm:$0xff]  }
 0x171   :  { %v1144_v33 = vrot.slane %v1143_v30, 1  ;;  %v1654_v34 = vsel %vm808_vm6, 1.0, %v1850_v1  ;;  %vm777_vm4 = vmand %vm646_vm3, %vm695_vm0  ;;  %vm1271_vm3 = vcmask 1047559   ;;  %vm1534_vm6 = vcmask 7168  }
 0x172   :  { %v1164_v15 = vadd.f32 %v1163_v32, %v1162_v21  ;;  %v1222_v29 = vadd.f32 %v1654_v34, %v1221_v20  ;;  %v1623_v35 = vsel %vm777_vm4, 1.0, %v1850_v1  ;;  %v562_v36 = vpop.permute.xlu1 %561  ;;  %v432_v39 = vpop.permute.xlu0 %431  ;;  %v1832_v21 = vld [vmem:[%s2917_s2 + $0x20] sm:$0xff]  }
 0x173   :  { %v1145_v40 = vadd.f32 %v1144_v33, %v1143_v30  ;;  %v1181_v43 = vadd.f32 %v1623_v35, %v1180_v62  ;;  %vm693_vm14 = vcmp.eq.s32.totalorder %v562_v36, %v1994_v38  ;;  %vm662_vm9 = vcmp.eq.s32.totalorder %v432_v39, %v1994_v38 }
 0x174   :  { %v1165_v17 = vrot.slane %v1164_v15, 1  ;;  %vm824_vm7 = vmand %vm693_vm14, %vm695_vm0 }
 0x175   :  { %v1182_v19 = vrot.slane %v1181_v43, 4  ;;  %v1670_v37 = vsel %vm824_vm7, 1.0, %v1850_v1  ;;  %vm793_vm12 = vmand %vm662_vm9, %vm695_vm0  ;;  %v1262_v44 = vsel %vm1261_vm8, %v1145_v40, %v1260_v23  ;;  %v1829_v23 = vld [vmem:[%s2917_s2 + $0x8] sm:$0xff]  }
 0x176   :  { %v1166_v46 = vadd.f32 %v1165_v17, %v1164_v15  ;;  %v1243_v45 = vadd.f32 %v1670_v37, %v1242_v26  ;;  %v1639_v7 = vsel %vm793_vm12, 1.0, %v1850_v1  ;;  %v566_v47 = vpop.permute.xlu1 %565  ;;  %v499_v48 = vpop.permute.xlu0 %498  ;;  %1784 = vmatpush3.bf16.msra.mxu1 %v1829_v23  ;;  %v1833_v26 = vld [vmem:[%s2917_s2 + $0x28] sm:$0xff]  }
 0x177   :  { %v1183_v49 = vadd.f32 %v1182_v19, %v1181_v43  ;;  %v1202_v50 = vadd.f32 %v1639_v7, %v1201_v31  ;;  %vm694_vm2 = vcmp.eq.s32.totalorder %v566_v47, %v1994_v38  ;;  %vm678_vm10 = vcmp.eq.s32.totalorder %v499_v48, %v1994_v38  ;;  %1785 = vmatprep.subr.bf16.mxu1 %v1850_v1 }
 0x178   :  { %vm825_vm5 = vmand %vm694_vm2, %vm695_vm0  ;;  %v1264_v41 = vsel %vm1263_vm15, %v1166_v46, %v1262_v44 }
 0x179   :  { %v1184_v51 = vrot.slane %v1183_v49, 2  ;;  %v1203_v6 = vrot.slane %v1202_v50, 4  ;;  %v1671_v53 = vsel %vm825_vm5, 1.0, %v1850_v1  ;;  %vm809_vm1 = vmand %vm678_vm10, %vm695_vm0  ;;  %vm1267_vm0 = vcmask 1045509  }
 0x17a   :  { %v1244_v42 = vadd.f32 %v1671_v53, %v1243_v45  ;;  %v1655_v54 = vsel %vm809_vm1, 1.0, %v1850_v1  ;;  %1786 = vmatpush3.bf16.msra.mxu1 %v1830_v24 }
 0x17b   :  { %v1185_v55 = vadd.f32 %v1184_v51, %v1183_v49  ;;  %v1204_v57 = vadd.f32 %v1203_v6, %v1202_v50  ;;  %v1223_v58 = vadd.f32 %v1655_v54, %v1222_v29  ;;  %1787 = vmatprep.subr.bf16.mxu1 %v1850_v1  ;;  %v1672_v29 = vld [vmem:[%s2918_s3] ss:$0 sm:$0xff] }
 0x17c   :  { %v1245_v59 = vrot.slane %v1244_v42, 4 }
 0x17d   :  { %v1186_v56 = vrot.slane %v1185_v55, 1  ;;  %v1205_v60 = vrot.slane %v1204_v57, 2  ;;  %v1224_v61 = vrot.slane %v1223_v58, 4 }
 0x17e   :  { %v1246_v62 = vadd.f32 %v1245_v59, %v1244_v42  ;;  %1788 = vmatpush3.bf16.msra.mxu1 %v1831_v25 }
 0x17f   :  { %v1187_v52 = vadd.f32 %v1186_v56, %v1185_v55  ;;  %v1206_v63 = vadd.f32 %v1205_v60, %v1204_v57  ;;  %v1225_v9 = vadd.f32 %v1224_v61, %v1223_v58  ;;  %1789 = vmatprep.subr.bf16.mxu1 %v1850_v1  ;;  %v1528_v61 = vld [vmem:[%s2920_s4] sm:$0xff] }
 0x180   :  { %v1247_v0 = vrot.slane %v1246_v62, 2 }
 0x181   :  { %v1207_v2 = vrot.slane %v1206_v63, 1  ;;  %v1226_v3 = vrot.slane %v1225_v9, 2  ;;  %v1266_v38 = vsel %vm1265_vm11, %v1187_v52, %v1264_v41 }
 0x182   :  { %v1248_v4 = vadd.f32 %v1247_v0, %v1246_v62  ;;  %1790 = vmatpush3.bf16.msra.mxu1 %v1832_v21 }
 0x183   :  { %v1208_v5 = vadd.f32 %v1207_v2, %v1206_v63  ;;  %v1227_v8 = vadd.f32 %v1226_v3, %v1225_v9  ;;  %1791 = vmatprep.subr.bf16.mxu1 %v1850_v1  ;;  %v1531_v9 = vsub.f32 1.0, %v1528_v61 }
 0x184   :  { %v1249_v11 = vrot.slane %v1248_v4, 1 }
 0x185   :  { %v1228_v10 = vrot.slane %v1227_v8, 1  ;;  %v1268_v12 = vsel %vm1267_vm0, %v1208_v5, %v1266_v38 }
 0x186   :  { %v1250_v14 = vadd.f32 %v1249_v11, %v1248_v4  ;;  %1792 = vmatpush3.bf16.msra.mxu1 %v1833_v26 }
 0x187   :  { %v1229_v16 = vadd.f32 %v1228_v10, %v1227_v8  ;;  %1793 = vmatprep.subr.bf16.mxu1 %v1850_v1 }
 0x189   :  { %v1270_v18 = vsel %vm1269_vm13, %v1229_v16, %v1268_v12 }
 0x18a   :  { %v1272_v20 = vsel %vm1271_vm3, %v1250_v14, %v1270_v18  ;;  %1794 = vmatpush3.bf16.msra.mxu1 %v1834_v27 }
 0x18b   :  { %1280 = vadd.xlane.f32.xlu0 %v1272_v20  ;;  %1779 = vmatmul.mubr.f32.vlgmr.msra.gmra.mrb[0].mxu0 %v1272_v20 }
 0x18c   :  { %1795 = vmatprep.subr.bf16.mxu1 %v1850_v1 }
 0x18e   :  { %1796 = vmatpush3.bf16.msra.mxu1 %v1835_v13 }
 0x218   :  { %v1281_v28 = vpop.xlane.xlu0 %1280 }
 0x219   :  { %v1282_v30 = vadd.f32 1e-06, %v1281_v28 }
 0x21b   :  { %1836 = vrcp.f32 %v1282_v30 }
 0x225   :  { %v1837_v31 = vpop.eup %1836 }
 0x25e   :  { %v1382_v32 = vpop.f32.mrb[0].mxu0 }
 0x25f   :  { %v1386_v33 = vmul.f32 %v1837_v31, %v1382_v32  ;;  %v1780_v34 = vpop.f32.mrb[1].mxu0 }
 0x261   :  { %v1387_v15 = vpack.c.bf16 %v1386_v33, %v1386_v33 }
 0x263   :  { %1798 = vmatmul.mubr.bf16.vlgmr.msra.gmra.mrb[0].mxu1 %v1387_v15 }
 0x336   :  { %v1493_v35 = vpop.f32.mrb[0].mxu1 }
 0x337   :  { %v1494_v1 = vadd.f32 %v1672_v29, %v1493_v35  ;;  %v1799_v36 = vpop.f32.mrb[1].mxu1 }
 0x338   :  { %v1496_v39 = vpop.f32.mrb[2].mxu1 }
 0x339   :  { %v1499_v40 = vsub.f32 0.0, %v1494_v1  ;;  %v1518_v43 = vand.u32 2147483647, %v1494_v1  ;;  %v1800_v17 = vpop.f32.mrb[3].mxu1  ;;  %v1517_v42 = vmax.f32 %v1494_v1, 0.0 }
 0x33b   :  { %v1500_v19 = vmul.f32 1.442695, %v1499_v40  ;;  %v1507_v37 = vand.u32 2147483647, %v1499_v40  ;;  %v1519_v44 = vsub.f32 0.0, %v1518_v43  ;;  %v1506_v57 = vmax.f32 %v1499_v40, 0.0 }
 0x33d   :  { %1838 = vpow2.f32 %v1500_v19  ;;  %v1508_v46 = vsub.f32 0.0, %v1507_v37  ;;  %v1520_v45 = vmul.f32 1.442695, %v1519_v44 }
 0x33f   :  { %v1509_v7 = vmul.f32 1.442695, %v1508_v46  ;;  %1840 = vpow2.f32 %v1520_v45 }
 0x341   :  { %1842 = vpow2.f32 %v1509_v7 }
 0x347   :  { %v1839_v47 = vpop.eup %1838 }
 0x348   :  { %v1502_v48 = vadd.f32 1.0, %v1839_v47 }
 0x349   :  { %v1841_v49 = vpop.eup %1840 }
 0x34a   :  { %1844 = vrcp.f32 %v1502_v48  ;;  %v1522_v50 = vadd.f32 1.0, %v1841_v49 }
 0x34b   :  { %v1843_v41 = vpop.eup %1842 }
 0x34c   :  { %v1511_v51 = vadd.f32 1.0, %v1843_v41  ;;  %1846 = vlog2.f32 %v1522_v50 }
 0x34e   :  { %1848 = vlog2.f32 %v1511_v51 }
 0x354   :  { %v1845_v6 = vpop.eup %1844 }
 0x355   :  { %1505 = vst [vmem:[%s2919_s5] sm:$0xff] %v1845_v6 }
 0x356   :  { %v1847_v53 = vpop.eup %1846 }
 0x357   :  { %v1524_v54 = vmul.f32 0.6931472, %v1847_v53 }
 0x358   :  { %v1849_v55 = vpop.eup %1848 }
 0x359   :  { %v1513_v58 = vmul.f32 0.6931472, %v1849_v55  ;;  %v1525_v59 = vadd.f32 %v1524_v54, %v1517_v42 }
 0x35b   :  { %v1514_v56 = vadd.f32 %v1513_v58, %v1506_v57  ;;  %v1526_v60 = vsub.f32 0.0, %v1525_v59 }
 0x35d   :  { %v1515_v62 = vsub.f32 0.0, %v1514_v56  ;;  %v1527_v63 = vmax.f32 %v1526_v60, -23.02585 }
 0x35f   :  { %v1516_v52 = vmax.f32 %v1515_v62, -23.02585  ;;  %v1532_v3 = vmul.f32 %v1531_v9, %v1527_v63 }
 0x361   :  { %v1529_v0 = vmul.f32 1.67, %v1516_v52 }
 0x363   :  { %v1530_v2 = vmul.f32 %v1529_v0, %v1528_v61 }
 0x365   :  { %v1533_v38 = vadd.f32 %v1532_v3, %v1530_v2 }
 0x367   :  { %1535 = vst.msk [vmem:[%s2921_s6] sm:$0xff] %vm1534_vm6, %v1533_v38 }

</bundles_post_ra>
